<compile_context>
chip_gen: v6e
topology: v6e:2x2x1
jax: 0.10.0
libtpu: 0.0.40
codegen_flags: <defaults>
</compile_context>

<pallas_src>
import jax
import jax.numpy as jnp
from jax.experimental import pallas as pl
from jax.experimental.pallas import tpu as pltpu

# ----------------------------- configuration -------------------------------
B = 2            # batch
S = 8            # sequence length
D = 32           # embedding_dim (hidden size)
H = 4            # attention heads
DH = D // H      # head dim
FFN = 64         # feed-forward hidden
VOCAB = 64       # vocabulary size
C = 8            # num_classes
N = B * S        # flattened token count
LANES = 128      # packed-slab lane width


# ------------------------------ kernel utils -------------------------------
def _layernorm(x, g, b, eps=1e-5):
    mu = jnp.mean(x, axis=-1, keepdims=True)
    var = jnp.mean((x - mu) ** 2, axis=-1, keepdims=True)
    return (x - mu) * jax.lax.rsqrt(var + eps) * g + b


# ------------------------------- parameters --------------------------------
def init_params(key):
    ks = jax.random.split(key, 10)
    std = 0.02
    p = {}
    p["tok_emb"] = jax.random.normal(ks[0], (VOCAB, D), jnp.float32) * std
    p["pos_emb"] = jax.random.normal(ks[1], (S, D), jnp.float32) * std
    p["wq"] = jax.random.normal(ks[2], (D, D), jnp.float32) * std
    p["bq"] = jnp.zeros((1, D), jnp.float32)
    p["wk"] = jax.random.normal(ks[3], (D, D), jnp.float32) * std
    p["bk"] = jnp.zeros((1, D), jnp.float32)
    p["wv"] = jax.random.normal(ks[4], (D, D), jnp.float32) * std
    p["bv"] = jnp.zeros((1, D), jnp.float32)
    p["wo"] = jax.random.normal(ks[5], (D, D), jnp.float32) * std
    p["bo"] = jnp.zeros((1, D), jnp.float32)
    p["ln1_g"] = jnp.ones((1, D), jnp.float32)
    p["ln1_b"] = jnp.zeros((1, D), jnp.float32)
    p["w1"] = jax.random.normal(ks[6], (D, FFN), jnp.float32) * std
    p["b1"] = jnp.zeros((1, FFN), jnp.float32)
    p["w2"] = jax.random.normal(ks[7], (FFN, D), jnp.float32) * std
    p["b2"] = jnp.zeros((1, D), jnp.float32)
    p["ln2_g"] = jnp.ones((1, D), jnp.float32)
    p["ln2_b"] = jnp.zeros((1, D), jnp.float32)
    # classification head (nn.Linear(embedding_dim, num_classes))
    p["head_w"] = jax.random.normal(ks[8], (D, C), jnp.float32) * std
    p["head_b"] = jnp.zeros((1, C), jnp.float32)
    return p


def pack_params(p):
    """Pack every weight/bias into one (rows, 128) f32 slab (single DMA).

    Each block starts on an 8-row (sublane) boundary so in-kernel static ref
    slices stay tile-aligned.  Returns (slab, offsets) with
    offsets[name] = (row_start, n_rows, n_cols) as Python ints.
    """
    entries = [
        ("tok_emb", p["tok_emb"]),
        ("pos_emb", jnp.tile(p["pos_emb"], (B, 1))),   # pre-tiled to (B*S, D)
        ("wq", p["wq"]), ("wk", p["wk"]), ("wv", p["wv"]), ("wo", p["wo"]),
        ("w1", p["w1"]), ("w2", p["w2"]), ("head_w", p["head_w"]),
        ("bq", p["bq"]), ("bk", p["bk"]), ("bv", p["bv"]), ("bo", p["bo"]),
        ("ln1_g", p["ln1_g"]), ("ln1_b", p["ln1_b"]),
        ("b1", p["b1"]), ("b2", p["b2"]),
        ("ln2_g", p["ln2_g"]), ("ln2_b", p["ln2_b"]),
        ("head_b", p["head_b"]),
    ]
    blocks, offsets, row = [], {}, 0
    for name, arr in entries:
        r, c = int(arr.shape[0]), int(arr.shape[1])
        rp = -(-r // 8) * 8                                  # pad rows to 8
        blk = jnp.zeros((rp, LANES), jnp.float32).at[:r, :c].set(
            arr.astype(jnp.float32))
        offsets[name] = (row, r, c)
        blocks.append(blk)
        row += rp
    return jnp.concatenate(blocks, axis=0), offsets


# --------------------------- fused forward kernel ---------------------------
def make_forward(offsets, slab_shape):
    def wref(slab_ref, name):
        r0, nr, nc = offsets[name]
        return slab_ref[r0:r0 + nr, 0:nc]    # static, 8-row-aligned ref slice

    def fused_kernel(tok_ref, bias_ref, slab_ref, out_ref):
        f32 = jnp.float32

        # ---- token embedding: one-hot gather on the (otherwise idle) MXU ----
        tok = tok_ref[...]                                        # (N, 1) int32
        vocab_ids = jax.lax.broadcasted_iota(jnp.int32, (N, VOCAB), 1)
        onehot = jnp.where(vocab_ids == tok, 1.0, 0.0)            # (N, VOCAB)
        x = (jnp.dot(onehot, wref(slab_ref, "tok_emb"),
                     preferred_element_type=f32)
             + wref(slab_ref, "pos_emb"))                         # (N, D)

        # -------------------------- self-attention ---------------------------
        bias = bias_ref[...]                                      # (N, N) additive
        q = jnp.dot(x, wref(slab_ref, "wq"),
                    preferred_element_type=f32) + wref(slab_ref, "bq")
        k = jnp.dot(x, wref(slab_ref, "wk"),
                    preferred_element_type=f32) + wref(slab_ref, "bk")
        v = jnp.dot(x, wref(slab_ref, "wv"),
                    preferred_element_type=f32) + wref(slab_ref, "bv")
        wo = wref(slab_ref, "wo")                                 # (D, D)

        scale = 1.0 / (DH ** 0.5)
        attn = jnp.zeros((N, D), f32)
        for h in range(H):                    # static unroll; heads are tiny
            sl = slice(h * DH, (h + 1) * DH)
            # q @ k^T via dot_general contracting last dims (no explicit .T)
            s = jax.lax.dot_general(q[:, sl], k[:, sl],
                                    (((1,), (1,)), ((), ())),
                                    preferred_element_type=f32) * scale + bias
            s = s - jnp.max(s, axis=-1, keepdims=True)
            p = jnp.exp(s)
            p = p / jnp.sum(p, axis=-1, keepdims=True)
            ctx = jnp.dot(p, v[:, sl], preferred_element_type=f32)   # (N, DH)
            # fold the output projection per head (avoids lane-axis concat)
            attn = attn + jnp.dot(ctx, wo[sl, :], preferred_element_type=f32)
        attn = attn + wref(slab_ref, "bo")

        h1 = _layernorm(x + attn, wref(slab_ref, "ln1_g"), wref(slab_ref, "ln1_b"))

        # ------------------------------ FFN ----------------------------------
        ff = jnp.dot(h1, wref(slab_ref, "w1"),
                     preferred_element_type=f32) + wref(slab_ref, "b1")
        # TODO(synk): PyTorch nn.GELU defaults to exact erf; tanh approx kept here.
        ff = jax.nn.gelu(ff)
        ff = jnp.dot(ff, wref(slab_ref, "w2"),
                     preferred_element_type=f32) + wref(slab_ref, "b2")

        h2 = _layernorm(h1 + ff, wref(slab_ref, "ln2_g"), wref(slab_ref, "ln2_b"))

        # ---- CLS pick (rows b*S) as a tiny selection matmul on the MXU ------
        sel = jnp.where(
            jax.lax.broadcasted_iota(jnp.int32, (B, N), 1)
            == jax.lax.broadcasted_iota(jnp.int32, (B, N), 0) * S,
            1.0, 0.0)                                             # (B, N)
        cls = jnp.dot(sel, h2, preferred_element_type=f32)        # (B, D)

        # ------------- classifier head: Linear -> softmax(dim=1) -------------
        logits = (jnp.dot(cls, wref(slab_ref, "head_w"),
                          preferred_element_type=f32) + wref(slab_ref, "head_b"))
        logits = logits - jnp.max(logits, axis=1, keepdims=True)
        e = jnp.exp(logits)
        out_ref[...] = (e / jnp.sum(e, axis=1, keepdims=True)).astype(out_ref.dtype)

    @jax.jit
    def forward(tokens, mask, slab):
        tok2 = tokens.reshape(N, 1).astype(jnp.int32)
        # Additive attention bias: 0 where query & key share a batch row AND
        # the key is not padding, -1e9 otherwise (tiny; fused by XLA).
        valid = mask.astype(jnp.float32)                          # (B, S)
        eye = jnp.eye(B, dtype=jnp.float32)
        allow = eye[:, :, None] * valid[None, :, :]               # (Bq, Bk, S)
        allow = jnp.broadcast_to(allow[:, None, :, :], (B, S, B, S)).reshape(N, N)
        attn_bias = (allow - 1.0) * 1e9                           # (N, N)

        return pl.pallas_call(
            fused_kernel,
            out_shape=jax.ShapeDtypeStruct((B, C), jnp.float32),
            grid=(1,),                       # single step: whole problem fits
            in_specs=[
                pl.BlockSpec((N, 1), lambda i: (0, 0)),
                pl.BlockSpec((N, N), lambda i: (0, 0)),
                pl.BlockSpec(slab_shape, lambda i: (0, 0)),
            ],
            out_specs=pl.BlockSpec((B, C), lambda i: (0, 0)),
            compiler_params=pltpu.CompilerParams(
                dimension_semantics=("arbitrary",)),  # no megacore split: 1 step
        )(tok2, attn_bias, slab)

    return forward


# ---------------------------- pure-JAX reference ----------------------------
def reference_forward(tokens, mask, params):
    x = params["tok_emb"][tokens] + params["pos_emb"][None]       # (B, S, D)
    neg = (mask.astype(jnp.float32) - 1.0)[:, None, None, :] * 1e9  # (B,1,1,S)
    q = x @ params["wq"] + params["bq"]
    k = x @ params["wk"] + params["bk"]
    v = x @ params["wv"] + params["bv"]
    qh = q.reshape(B, S, H, DH).transpose(0, 2, 1, 3)
    kh = k.reshape(B, S, H, DH).transpose(0, 2, 1, 3)
    vh = v.reshape(B, S, H, DH).transpose(0, 2, 1, 3)
    s = jnp.einsum("bhqd,bhkd->bhqk", qh, kh) / (DH ** 0.5) + neg
    p = jax.nn.softmax(s, axis=-1)
    ctx = jnp.einsum("bhqk,bhkd->bhqd", p, vh).transpose(0, 2, 1, 3).reshape(B, S, D)
    attn = ctx @ params["wo"] + params["bo"]

    def ln(t, g, b):
        mu = t.mean(-1, keepdims=True)
        var = ((t - mu) ** 2).mean(-1, keepdims=True)
        return (t - mu) * jax.lax.rsqrt(var + 1e-5) * g + b

    h1 = ln(x + attn, params["ln1_g"], params["ln1_b"])
    ff = jax.nn.gelu(h1 @ params["w1"] + params["b1"])
    ff = ff @ params["w2"] + params["b2"]
    h2 = ln(h1 + ff, params["ln2_g"], params["ln2_b"])
    logits = h2[:, 0] @ params["head_w"] + params["head_b"]
    return jax.nn.softmax(logits, axis=1)


# ---------------------------------- main ------------------------------------
if __name__ == "__main__":
    key = jax.random.PRNGKey(0)
    k_tok, k_par = jax.random.split(key)

    tokens = jax.random.randint(k_tok, (B, S), 0, VOCAB, dtype=jnp.int32)
    mask = jnp.ones((B, S), jnp.float32).at[1, 6:].set(0.0)   # pad tail of sample 1

    params = init_params(k_par)
    slab, offsets = pack_params(params)
    forward = make_forward(offsets, tuple(slab.shape))

    probs = forward(tokens, mask, slab)
    probs = jax.block_until_ready(probs)

    ref = reference_forward(tokens, mask, params)

    assert probs.shape == (B, C)
    assert bool(jnp.all(jnp.isfinite(probs)))
    assert bool(jnp.allclose(jnp.sum(probs, axis=1), 1.0, atol=1e-5))
    # loose tol: XLA's default f32 matmul precision on TPU differs slightly
    # from the kernel's f32 MXU accumulation.
    assert bool(jnp.allclose(probs, ref, atol=2e-3, rtol=2e-3))
    print("KERNEL_OK")
</pallas_src>

<mosaic_0001>
module attributes {stable_mosaic.version = 11 : i64} {
  func.func @fused_kernel(%arg0: i32, %arg1: memref<16x1xi32, #tpu.memory_space<vmem>>, %arg2: memref<16x16xf32, #tpu.memory_space<vmem>>, %arg3: memref<424x128xf32, #tpu.memory_space<vmem>>, %arg4: memref<2x8xf32, #tpu.memory_space<vmem>>) attributes {dimension_semantics = [#tpu.dimension_semantics<arbitrary>], iteration_bounds = array<i64: 1>, scalar_prefetch = 0 : i64, scratch_operands = 0 : i64, tpu.core_type = #tpu.core_type<tc>, window_params = [{pipeline_mode = #tpu.pipeline_mode<synchronous>, transform_indices = @transform_0, window_bounds = array<i64: 16, 1>}, {pipeline_mode = #tpu.pipeline_mode<synchronous>, transform_indices = @transform_1, window_bounds = array<i64: 16, 16>}, {pipeline_mode = #tpu.pipeline_mode<synchronous>, transform_indices = @transform_2, window_bounds = array<i64: 424, 128>}, {pipeline_mode = #tpu.pipeline_mode<synchronous>, transform_indices = @transform_3, window_bounds = array<i64: 2, 8>}]} {
    %c0 = arith.constant 0 : index
    %c0_0 = arith.constant 0 : index
    %0 = vector.load %arg1[%c0, %c0_0] : memref<16x1xi32, #tpu.memory_space<vmem>>, vector<16x1xi32>
    %1 = tpu.iota {dimensions = array<i32: 1>} : vector<16x64xi32>
    %2 = vector.broadcast %0 : vector<16x1xi32> to vector<16x64xi32>
    %3 = arith.cmpi eq, %1, %2 : vector<16x64xi32>
    %cst = arith.constant 1.000000e+00 : f32
    %cst_1 = arith.constant 0.000000e+00 : f32
    %4 = vector.broadcast %cst : f32 to vector<16x64xf32>
    %5 = vector.broadcast %cst_1 : f32 to vector<16x64xf32>
    %6 = arith.select %3, %4, %5 : vector<16x64xi1>, vector<16x64xf32>
    %c0_2 = arith.constant 0 : index
    %c0_3 = arith.constant 0 : index
    %7 = vector.load %arg3[%c0_2, %c0_3] : memref<424x128xf32, #tpu.memory_space<vmem>>, vector<64x32xf32>
    %cst_4 = arith.constant dense<0.000000e+00> : vector<16x32xf32>
    %8 = tpu.matmul %6, %7, %cst_4 {dimension_numbers = #tpu.dot_dimension_numbers<[1], [0], [0], [1], [0, 0, 1, 1], [], []>} : vector<16x64xf32>, vector<64x32xf32>, vector<16x32xf32> -> vector<16x32xf32>
    %c64 = arith.constant 64 : index
    %c0_5 = arith.constant 0 : index
    %9 = vector.load %arg3[%c64, %c0_5] : memref<424x128xf32, #tpu.memory_space<vmem>>, vector<16x32xf32>
    %10 = arith.addf %8, %9 : vector<16x32xf32>
    %c0_6 = arith.constant 0 : index
    %c0_7 = arith.constant 0 : index
    %11 = vector.load %arg2[%c0_6, %c0_7] : memref<16x16xf32, #tpu.memory_space<vmem>>, vector<16x16xf32>
    %c80 = arith.constant 80 : index
    %c0_8 = arith.constant 0 : index
    %12 = vector.load %arg3[%c80, %c0_8] : memref<424x128xf32, #tpu.memory_space<vmem>>, vector<32x32xf32>
    %cst_9 = arith.constant dense<0.000000e+00> : vector<16x32xf32>
    %13 = tpu.matmul %10, %12, %cst_9 {dimension_numbers = #tpu.dot_dimension_numbers<[1], [0], [0], [1], [0, 0, 1, 1], [], []>} : vector<16x32xf32>, vector<32x32xf32>, vector<16x32xf32> -> vector<16x32xf32>
    %c336 = arith.constant 336 : index
    %c0_10 = arith.constant 0 : index
    %14 = vector.load %arg3[%c336, %c0_10] : memref<424x128xf32, #tpu.memory_space<vmem>>, vector<1x32xf32>
    %15 = vector.broadcast %14 : vector<1x32xf32> to vector<16x32xf32>
    %16 = arith.addf %13, %15 : vector<16x32xf32>
    %c112 = arith.constant 112 : index
    %c0_11 = arith.constant 0 : index
    %17 = vector.load %arg3[%c112, %c0_11] : memref<424x128xf32, #tpu.memory_space<vmem>>, vector<32x32xf32>
    %cst_12 = arith.constant dense<0.000000e+00> : vector<16x32xf32>
    %18 = tpu.matmul %10, %17, %cst_12 {dimension_numbers = #tpu.dot_dimension_numbers<[1], [0], [0], [1], [0, 0, 1, 1], [], []>} : vector<16x32xf32>, vector<32x32xf32>, vector<16x32xf32> -> vector<16x32xf32>
    %c344 = arith.constant 344 : index
    %c0_13 = arith.constant 0 : index
    %19 = vector.load %arg3[%c344, %c0_13] : memref<424x128xf32, #tpu.memory_space<vmem>>, vector<1x32xf32>
    %20 = vector.broadcast %19 : vector<1x32xf32> to vector<16x32xf32>
    %21 = arith.addf %18, %20 : vector<16x32xf32>
    %c144 = arith.constant 144 : index
    %c0_14 = arith.constant 0 : index
    %22 = vector.load %arg3[%c144, %c0_14] : memref<424x128xf32, #tpu.memory_space<vmem>>, vector<32x32xf32>
    %cst_15 = arith.constant dense<0.000000e+00> : vector<16x32xf32>
    %23 = tpu.matmul %10, %22, %cst_15 {dimension_numbers = #tpu.dot_dimension_numbers<[1], [0], [0], [1], [0, 0, 1, 1], [], []>} : vector<16x32xf32>, vector<32x32xf32>, vector<16x32xf32> -> vector<16x32xf32>
    %c352 = arith.constant 352 : index
    %c0_16 = arith.constant 0 : index
    %24 = vector.load %arg3[%c352, %c0_16] : memref<424x128xf32, #tpu.memory_space<vmem>>, vector<1x32xf32>
    %25 = vector.broadcast %24 : vector<1x32xf32> to vector<16x32xf32>
    %26 = arith.addf %23, %25 : vector<16x32xf32>
    %c176 = arith.constant 176 : index
    %c0_17 = arith.constant 0 : index
    %27 = vector.load %arg3[%c176, %c0_17] : memref<424x128xf32, #tpu.memory_space<vmem>>, vector<32x32xf32>
    %cst_18 = arith.constant 0.000000e+00 : f32
    %28 = vector.broadcast %cst_18 : f32 to vector<16x32xf32>
    %29 = vector.extract_strided_slice %16 {offsets = [0, 0], sizes = [16, 8], strides = [1, 1]} : vector<16x32xf32> to vector<16x8xf32>
    %30 = vector.extract_strided_slice %21 {offsets = [0, 0], sizes = [16, 8], strides = [1, 1]} : vector<16x32xf32> to vector<16x8xf32>
    %cst_19 = arith.constant dense<0.000000e+00> : vector<16x16xf32>
    %31 = tpu.matmul %29, %30, %cst_19 {dimension_numbers = #tpu.dot_dimension_numbers<[1], [1], [0], [0], [0, 0, 1, 0], [], []>} : vector<16x8xf32>, vector<16x8xf32>, vector<16x16xf32> -> vector<16x16xf32>
    %cst_20 = arith.constant 0.353553385 : f32
    %32 = vector.broadcast %cst_20 : f32 to vector<16x16xf32>
    %33 = arith.mulf %31, %32 : vector<16x16xf32>
    %34 = arith.addf %33, %11 : vector<16x16xf32>
    %cst_21 = arith.constant dense<0xFF800000> : vector<16xf32>
    %35 = vector.multi_reduction <maximumf>, %34, %cst_21 [1] : vector<16x16xf32> to vector<16xf32>
    %36 = vector.shape_cast %35 : vector<16xf32> to vector<16x1xf32>
    %37 = vector.broadcast %36 : vector<16x1xf32> to vector<16x16xf32>
    %38 = arith.subf %34, %37 : vector<16x16xf32>
    %39 = math.exp %38 : vector<16x16xf32>
    %cst_22 = arith.constant dense<0.000000e+00> : vector<16xf32>
    %40 = vector.multi_reduction <add>, %39, %cst_22 [1] : vector<16x16xf32> to vector<16xf32>
    %41 = vector.shape_cast %40 : vector<16xf32> to vector<16x1xf32>
    %42 = vector.broadcast %41 : vector<16x1xf32> to vector<16x16xf32>
    %43 = arith.divf %39, %42 : vector<16x16xf32>
    %44 = vector.extract_strided_slice %26 {offsets = [0, 0], sizes = [16, 8], strides = [1, 1]} : vector<16x32xf32> to vector<16x8xf32>
    %cst_23 = arith.constant dense<0.000000e+00> : vector<16x8xf32>
    %45 = tpu.matmul %43, %44, %cst_23 {dimension_numbers = #tpu.dot_dimension_numbers<[1], [0], [0], [1], [0, 0, 1, 1], [], []>} : vector<16x16xf32>, vector<16x8xf32>, vector<16x8xf32> -> vector<16x8xf32>
    %46 = vector.extract_strided_slice %27 {offsets = [0, 0], sizes = [8, 32], strides = [1, 1]} : vector<32x32xf32> to vector<8x32xf32>
    %cst_24 = arith.constant dense<0.000000e+00> : vector<16x32xf32>
    %47 = tpu.matmul %45, %46, %cst_24 {dimension_numbers = #tpu.dot_dimension_numbers<[1], [0], [0], [1], [0, 0, 1, 1], [], []>} : vector<16x8xf32>, vector<8x32xf32>, vector<16x32xf32> -> vector<16x32xf32>
    %48 = arith.addf %28, %47 : vector<16x32xf32>
    %49 = vector.extract_strided_slice %16 {offsets = [0, 8], sizes = [16, 8], strides = [1, 1]} : vector<16x32xf32> to vector<16x8xf32>
    %50 = vector.extract_strided_slice %21 {offsets = [0, 8], sizes = [16, 8], strides = [1, 1]} : vector<16x32xf32> to vector<16x8xf32>
    %cst_25 = arith.constant dense<0.000000e+00> : vector<16x16xf32>
    %51 = tpu.matmul %49, %50, %cst_25 {dimension_numbers = #tpu.dot_dimension_numbers<[1], [1], [0], [0], [0, 0, 1, 0], [], []>} : vector<16x8xf32>, vector<16x8xf32>, vector<16x16xf32> -> vector<16x16xf32>
    %cst_26 = arith.constant 0.353553385 : f32
    %52 = vector.broadcast %cst_26 : f32 to vector<16x16xf32>
    %53 = arith.mulf %51, %52 : vector<16x16xf32>
    %54 = arith.addf %53, %11 : vector<16x16xf32>
    %cst_27 = arith.constant dense<0xFF800000> : vector<16xf32>
    %55 = vector.multi_reduction <maximumf>, %54, %cst_27 [1] : vector<16x16xf32> to vector<16xf32>
    %56 = vector.shape_cast %55 : vector<16xf32> to vector<16x1xf32>
    %57 = vector.broadcast %56 : vector<16x1xf32> to vector<16x16xf32>
    %58 = arith.subf %54, %57 : vector<16x16xf32>
    %59 = math.exp %58 : vector<16x16xf32>
    %cst_28 = arith.constant dense<0.000000e+00> : vector<16xf32>
    %60 = vector.multi_reduction <add>, %59, %cst_28 [1] : vector<16x16xf32> to vector<16xf32>
    %61 = vector.shape_cast %60 : vector<16xf32> to vector<16x1xf32>
    %62 = vector.broadcast %61 : vector<16x1xf32> to vector<16x16xf32>
    %63 = arith.divf %59, %62 : vector<16x16xf32>
    %64 = vector.extract_strided_slice %26 {offsets = [0, 8], sizes = [16, 8], strides = [1, 1]} : vector<16x32xf32> to vector<16x8xf32>
    %cst_29 = arith.constant dense<0.000000e+00> : vector<16x8xf32>
    %65 = tpu.matmul %63, %64, %cst_29 {dimension_numbers = #tpu.dot_dimension_numbers<[1], [0], [0], [1], [0, 0, 1, 1], [], []>} : vector<16x16xf32>, vector<16x8xf32>, vector<16x8xf32> -> vector<16x8xf32>
    %66 = vector.extract_strided_slice %27 {offsets = [8, 0], sizes = [8, 32], strides = [1, 1]} : vector<32x32xf32> to vector<8x32xf32>
    %cst_30 = arith.constant dense<0.000000e+00> : vector<16x32xf32>
    %67 = tpu.matmul %65, %66, %cst_30 {dimension_numbers = #tpu.dot_dimension_numbers<[1], [0], [0], [1], [0, 0, 1, 1], [], []>} : vector<16x8xf32>, vector<8x32xf32>, vector<16x32xf32> -> vector<16x32xf32>
    %68 = arith.addf %48, %67 : vector<16x32xf32>
    %69 = vector.extract_strided_slice %16 {offsets = [0, 16], sizes = [16, 8], strides = [1, 1]} : vector<16x32xf32> to vector<16x8xf32>
    %70 = vector.extract_strided_slice %21 {offsets = [0, 16], sizes = [16, 8], strides = [1, 1]} : vector<16x32xf32> to vector<16x8xf32>
    %cst_31 = arith.constant dense<0.000000e+00> : vector<16x16xf32>
    %71 = tpu.matmul %69, %70, %cst_31 {dimension_numbers = #tpu.dot_dimension_numbers<[1], [1], [0], [0], [0, 0, 1, 0], [], []>} : vector<16x8xf32>, vector<16x8xf32>, vector<16x16xf32> -> vector<16x16xf32>
    %cst_32 = arith.constant 0.353553385 : f32
    %72 = vector.broadcast %cst_32 : f32 to vector<16x16xf32>
    %73 = arith.mulf %71, %72 : vector<16x16xf32>
    %74 = arith.addf %73, %11 : vector<16x16xf32>
    %cst_33 = arith.constant dense<0xFF800000> : vector<16xf32>
    %75 = vector.multi_reduction <maximumf>, %74, %cst_33 [1] : vector<16x16xf32> to vector<16xf32>
    %76 = vector.shape_cast %75 : vector<16xf32> to vector<16x1xf32>
    %77 = vector.broadcast %76 : vector<16x1xf32> to vector<16x16xf32>
    %78 = arith.subf %74, %77 : vector<16x16xf32>
    %79 = math.exp %78 : vector<16x16xf32>
    %cst_34 = arith.constant dense<0.000000e+00> : vector<16xf32>
    %80 = vector.multi_reduction <add>, %79, %cst_34 [1] : vector<16x16xf32> to vector<16xf32>
    %81 = vector.shape_cast %80 : vector<16xf32> to vector<16x1xf32>
    %82 = vector.broadcast %81 : vector<16x1xf32> to vector<16x16xf32>
    %83 = arith.divf %79, %82 : vector<16x16xf32>
    %84 = vector.extract_strided_slice %26 {offsets = [0, 16], sizes = [16, 8], strides = [1, 1]} : vector<16x32xf32> to vector<16x8xf32>
    %cst_35 = arith.constant dense<0.000000e+00> : vector<16x8xf32>
    %85 = tpu.matmul %83, %84, %cst_35 {dimension_numbers = #tpu.dot_dimension_numbers<[1], [0], [0], [1], [0, 0, 1, 1], [], []>} : vector<16x16xf32>, vector<16x8xf32>, vector<16x8xf32> -> vector<16x8xf32>
    %86 = vector.extract_strided_slice %27 {offsets = [16, 0], sizes = [8, 32], strides = [1, 1]} : vector<32x32xf32> to vector<8x32xf32>
    %cst_36 = arith.constant dense<0.000000e+00> : vector<16x32xf32>
    %87 = tpu.matmul %85, %86, %cst_36 {dimension_numbers = #tpu.dot_dimension_numbers<[1], [0], [0], [1], [0, 0, 1, 1], [], []>} : vector<16x8xf32>, vector<8x32xf32>, vector<16x32xf32> -> vector<16x32xf32>
    %88 = arith.addf %68, %87 : vector<16x32xf32>
    %89 = vector.extract_strided_slice %16 {offsets = [0, 24], sizes = [16, 8], strides = [1, 1]} : vector<16x32xf32> to vector<16x8xf32>
    %90 = vector.extract_strided_slice %21 {offsets = [0, 24], sizes = [16, 8], strides = [1, 1]} : vector<16x32xf32> to vector<16x8xf32>
    %cst_37 = arith.constant dense<0.000000e+00> : vector<16x16xf32>
    %91 = tpu.matmul %89, %90, %cst_37 {dimension_numbers = #tpu.dot_dimension_numbers<[1], [1], [0], [0], [0, 0, 1, 0], [], []>} : vector<16x8xf32>, vector<16x8xf32>, vector<16x16xf32> -> vector<16x16xf32>
    %cst_38 = arith.constant 0.353553385 : f32
    %92 = vector.broadcast %cst_38 : f32 to vector<16x16xf32>
    %93 = arith.mulf %91, %92 : vector<16x16xf32>
    %94 = arith.addf %93, %11 : vector<16x16xf32>
    %cst_39 = arith.constant dense<0xFF800000> : vector<16xf32>
    %95 = vector.multi_reduction <maximumf>, %94, %cst_39 [1] : vector<16x16xf32> to vector<16xf32>
    %96 = vector.shape_cast %95 : vector<16xf32> to vector<16x1xf32>
    %97 = vector.broadcast %96 : vector<16x1xf32> to vector<16x16xf32>
    %98 = arith.subf %94, %97 : vector<16x16xf32>
    %99 = math.exp %98 : vector<16x16xf32>
    %cst_40 = arith.constant dense<0.000000e+00> : vector<16xf32>
    %100 = vector.multi_reduction <add>, %99, %cst_40 [1] : vector<16x16xf32> to vector<16xf32>
    %101 = vector.shape_cast %100 : vector<16xf32> to vector<16x1xf32>
    %102 = vector.broadcast %101 : vector<16x1xf32> to vector<16x16xf32>
    %103 = arith.divf %99, %102 : vector<16x16xf32>
    %104 = vector.extract_strided_slice %26 {offsets = [0, 24], sizes = [16, 8], strides = [1, 1]} : vector<16x32xf32> to vector<16x8xf32>
    %cst_41 = arith.constant dense<0.000000e+00> : vector<16x8xf32>
    %105 = tpu.matmul %103, %104, %cst_41 {dimension_numbers = #tpu.dot_dimension_numbers<[1], [0], [0], [1], [0, 0, 1, 1], [], []>} : vector<16x16xf32>, vector<16x8xf32>, vector<16x8xf32> -> vector<16x8xf32>
    %106 = vector.extract_strided_slice %27 {offsets = [24, 0], sizes = [8, 32], strides = [1, 1]} : vector<32x32xf32> to vector<8x32xf32>
    %cst_42 = arith.constant dense<0.000000e+00> : vector<16x32xf32>
    %107 = tpu.matmul %105, %106, %cst_42 {dimension_numbers = #tpu.dot_dimension_numbers<[1], [0], [0], [1], [0, 0, 1, 1], [], []>} : vector<16x8xf32>, vector<8x32xf32>, vector<16x32xf32> -> vector<16x32xf32>
    %108 = arith.addf %88, %107 : vector<16x32xf32>
    %c360 = arith.constant 360 : index
    %c0_43 = arith.constant 0 : index
    %109 = vector.load %arg3[%c360, %c0_43] : memref<424x128xf32, #tpu.memory_space<vmem>>, vector<1x32xf32>
    %110 = vector.broadcast %109 : vector<1x32xf32> to vector<16x32xf32>
    %111 = arith.addf %108, %110 : vector<16x32xf32>
    %112 = arith.addf %10, %111 : vector<16x32xf32>
    %c368 = arith.constant 368 : index
    %c0_44 = arith.constant 0 : index
    %113 = vector.load %arg3[%c368, %c0_44] : memref<424x128xf32, #tpu.memory_space<vmem>>, vector<1x32xf32>
    %c376 = arith.constant 376 : index
    %c0_45 = arith.constant 0 : index
    %114 = vector.load %arg3[%c376, %c0_45] : memref<424x128xf32, #tpu.memory_space<vmem>>, vector<1x32xf32>
    %cst_46 = arith.constant dense<0.000000e+00> : vector<16xf32>
    %115 = vector.multi_reduction <add>, %112, %cst_46 [1] : vector<16x32xf32> to vector<16xf32>
    %116 = vector.shape_cast %115 : vector<16xf32> to vector<16x1xf32>
    %cst_47 = arith.constant 3.200000e+01 : f32
    %117 = vector.broadcast %cst_47 : f32 to vector<16x1xf32>
    %118 = arith.divf %116, %117 : vector<16x1xf32>
    %119 = vector.broadcast %118 : vector<16x1xf32> to vector<16x32xf32>
    %120 = arith.subf %112, %119 : vector<16x32xf32>
    %121 = arith.mulf %120, %120 : vector<16x32xf32>
    %cst_48 = arith.constant dense<0.000000e+00> : vector<16xf32>
    %122 = vector.multi_reduction <add>, %121, %cst_48 [1] : vector<16x32xf32> to vector<16xf32>
    %123 = vector.shape_cast %122 : vector<16xf32> to vector<16x1xf32>
    %cst_49 = arith.constant 3.200000e+01 : f32
    %124 = vector.broadcast %cst_49 : f32 to vector<16x1xf32>
    %125 = arith.divf %123, %124 : vector<16x1xf32>
    %126 = vector.broadcast %118 : vector<16x1xf32> to vector<16x32xf32>
    %127 = arith.subf %112, %126 : vector<16x32xf32>
    %cst_50 = arith.constant 9.99999974E-6 : f32
    %128 = vector.broadcast %cst_50 : f32 to vector<16x1xf32>
    %129 = arith.addf %125, %128 : vector<16x1xf32>
    %130 = math.rsqrt %129 : vector<16x1xf32>
    %131 = vector.broadcast %130 : vector<16x1xf32> to vector<16x32xf32>
    %132 = arith.mulf %127, %131 : vector<16x32xf32>
    %133 = vector.broadcast %113 : vector<1x32xf32> to vector<16x32xf32>
    %134 = arith.mulf %132, %133 : vector<16x32xf32>
    %135 = vector.broadcast %114 : vector<1x32xf32> to vector<16x32xf32>
    %136 = arith.addf %134, %135 : vector<16x32xf32>
    %c208 = arith.constant 208 : index
    %c0_51 = arith.constant 0 : index
    %137 = vector.load %arg3[%c208, %c0_51] : memref<424x128xf32, #tpu.memory_space<vmem>>, vector<32x64xf32>
    %cst_52 = arith.constant dense<0.000000e+00> : vector<16x64xf32>
    %138 = tpu.matmul %136, %137, %cst_52 {dimension_numbers = #tpu.dot_dimension_numbers<[1], [0], [0], [1], [0, 0, 1, 1], [], []>} : vector<16x32xf32>, vector<32x64xf32>, vector<16x64xf32> -> vector<16x64xf32>
    %c384 = arith.constant 384 : index
    %c0_53 = arith.constant 0 : index
    %139 = vector.load %arg3[%c384, %c0_53] : memref<424x128xf32, #tpu.memory_space<vmem>>, vector<1x64xf32>
    %140 = vector.broadcast %139 : vector<1x64xf32> to vector<16x64xf32>
    %141 = arith.addf %138, %140 : vector<16x64xf32>
    %142 = arith.mulf %141, %141 : vector<16x64xf32>
    %143 = arith.mulf %141, %142 : vector<16x64xf32>
    %cst_54 = arith.constant 4.471500e-02 : f32
    %144 = vector.broadcast %cst_54 : f32 to vector<16x64xf32>
    %145 = arith.mulf %144, %143 : vector<16x64xf32>
    %146 = arith.addf %141, %145 : vector<16x64xf32>
    %cst_55 = arith.constant 0.797884583 : f32
    %147 = vector.broadcast %cst_55 : f32 to vector<16x64xf32>
    %148 = arith.mulf %147, %146 : vector<16x64xf32>
    %149 = math.tanh %148 : vector<16x64xf32>
    %cst_56 = arith.constant 1.000000e+00 : f32
    %150 = vector.broadcast %cst_56 : f32 to vector<16x64xf32>
    %151 = arith.addf %150, %149 : vector<16x64xf32>
    %cst_57 = arith.constant 5.000000e-01 : f32
    %152 = vector.broadcast %cst_57 : f32 to vector<16x64xf32>
    %153 = arith.mulf %152, %151 : vector<16x64xf32>
    %154 = arith.mulf %141, %153 : vector<16x64xf32>
    %c240 = arith.constant 240 : index
    %c0_58 = arith.constant 0 : index
    %155 = vector.load %arg3[%c240, %c0_58] : memref<424x128xf32, #tpu.memory_space<vmem>>, vector<64x32xf32>
    %cst_59 = arith.constant dense<0.000000e+00> : vector<16x32xf32>
    %156 = tpu.matmul %154, %155, %cst_59 {dimension_numbers = #tpu.dot_dimension_numbers<[1], [0], [0], [1], [0, 0, 1, 1], [], []>} : vector<16x64xf32>, vector<64x32xf32>, vector<16x32xf32> -> vector<16x32xf32>
    %c392 = arith.constant 392 : index
    %c0_60 = arith.constant 0 : index
    %157 = vector.load %arg3[%c392, %c0_60] : memref<424x128xf32, #tpu.memory_space<vmem>>, vector<1x32xf32>
    %158 = vector.broadcast %157 : vector<1x32xf32> to vector<16x32xf32>
    %159 = arith.addf %156, %158 : vector<16x32xf32>
    %160 = arith.addf %136, %159 : vector<16x32xf32>
    %c400 = arith.constant 400 : index
    %c0_61 = arith.constant 0 : index
    %161 = vector.load %arg3[%c400, %c0_61] : memref<424x128xf32, #tpu.memory_space<vmem>>, vector<1x32xf32>
    %c408 = arith.constant 408 : index
    %c0_62 = arith.constant 0 : index
    %162 = vector.load %arg3[%c408, %c0_62] : memref<424x128xf32, #tpu.memory_space<vmem>>, vector<1x32xf32>
    %cst_63 = arith.constant dense<0.000000e+00> : vector<16xf32>
    %163 = vector.multi_reduction <add>, %160, %cst_63 [1] : vector<16x32xf32> to vector<16xf32>
    %164 = vector.shape_cast %163 : vector<16xf32> to vector<16x1xf32>
    %cst_64 = arith.constant 3.200000e+01 : f32
    %165 = vector.broadcast %cst_64 : f32 to vector<16x1xf32>
    %166 = arith.divf %164, %165 : vector<16x1xf32>
    %167 = vector.broadcast %166 : vector<16x1xf32> to vector<16x32xf32>
    %168 = arith.subf %160, %167 : vector<16x32xf32>
    %169 = arith.mulf %168, %168 : vector<16x32xf32>
    %cst_65 = arith.constant dense<0.000000e+00> : vector<16xf32>
    %170 = vector.multi_reduction <add>, %169, %cst_65 [1] : vector<16x32xf32> to vector<16xf32>
    %171 = vector.shape_cast %170 : vector<16xf32> to vector<16x1xf32>
    %cst_66 = arith.constant 3.200000e+01 : f32
    %172 = vector.broadcast %cst_66 : f32 to vector<16x1xf32>
    %173 = arith.divf %171, %172 : vector<16x1xf32>
    %174 = vector.broadcast %166 : vector<16x1xf32> to vector<16x32xf32>
    %175 = arith.subf %160, %174 : vector<16x32xf32>
    %cst_67 = arith.constant 9.99999974E-6 : f32
    %176 = vector.broadcast %cst_67 : f32 to vector<16x1xf32>
    %177 = arith.addf %173, %176 : vector<16x1xf32>
    %178 = math.rsqrt %177 : vector<16x1xf32>
    %179 = vector.broadcast %178 : vector<16x1xf32> to vector<16x32xf32>
    %180 = arith.mulf %175, %179 : vector<16x32xf32>
    %181 = vector.broadcast %161 : vector<1x32xf32> to vector<16x32xf32>
    %182 = arith.mulf %180, %181 : vector<16x32xf32>
    %183 = vector.broadcast %162 : vector<1x32xf32> to vector<16x32xf32>
    %184 = arith.addf %182, %183 : vector<16x32xf32>
    %185 = tpu.iota {dimensions = array<i32: 1>} : vector<2x16xi32>
    %186 = tpu.iota {dimensions = array<i32: 0>} : vector<2x16xi32>
    %c8_i32 = arith.constant 8 : i32
    %187 = vector.broadcast %c8_i32 : i32 to vector<2x16xi32>
    %188 = arith.muli %186, %187 : vector<2x16xi32>
    %189 = arith.cmpi eq, %185, %188 : vector<2x16xi32>
    %cst_68 = arith.constant 1.000000e+00 : f32
    %cst_69 = arith.constant 0.000000e+00 : f32
    %190 = vector.broadcast %cst_68 : f32 to vector<2x16xf32>
    %191 = vector.broadcast %cst_69 : f32 to vector<2x16xf32>
    %192 = arith.select %189, %190, %191 : vector<2x16xi1>, vector<2x16xf32>
    %cst_70 = arith.constant dense<0.000000e+00> : vector<2x32xf32>
    %193 = tpu.matmul %192, %184, %cst_70 {dimension_numbers = #tpu.dot_dimension_numbers<[1], [0], [0], [1], [0, 0, 1, 1], [], []>} : vector<2x16xf32>, vector<16x32xf32>, vector<2x32xf32> -> vector<2x32xf32>
    %c304 = arith.constant 304 : index
    %c0_71 = arith.constant 0 : index
    %194 = vector.load %arg3[%c304, %c0_71] : memref<424x128xf32, #tpu.memory_space<vmem>>, vector<32x8xf32>
    %cst_72 = arith.constant dense<0.000000e+00> : vector<2x8xf32>
    %195 = tpu.matmul %193, %194, %cst_72 {dimension_numbers = #tpu.dot_dimension_numbers<[1], [0], [0], [1], [0, 0, 1, 1], [], []>} : vector<2x32xf32>, vector<32x8xf32>, vector<2x8xf32> -> vector<2x8xf32>
    %c416 = arith.constant 416 : index
    %c0_73 = arith.constant 0 : index
    %196 = vector.load %arg3[%c416, %c0_73] : memref<424x128xf32, #tpu.memory_space<vmem>>, vector<1x8xf32>
    %197 = vector.broadcast %196 : vector<1x8xf32> to vector<2x8xf32>
    %198 = arith.addf %195, %197 : vector<2x8xf32>
    %cst_74 = arith.constant dense<0xFF800000> : vector<2xf32>
    %199 = vector.multi_reduction <maximumf>, %198, %cst_74 [1] : vector<2x8xf32> to vector<2xf32>
    %200 = vector.shape_cast %199 : vector<2xf32> to vector<2x1xf32>
    %201 = vector.broadcast %200 : vector<2x1xf32> to vector<2x8xf32>
    %202 = arith.subf %198, %201 : vector<2x8xf32>
    %203 = math.exp %202 : vector<2x8xf32>
    %cst_75 = arith.constant dense<0.000000e+00> : vector<2xf32>
    %204 = vector.multi_reduction <add>, %203, %cst_75 [1] : vector<2x8xf32> to vector<2xf32>
    %205 = vector.shape_cast %204 : vector<2xf32> to vector<2x1xf32>
    %206 = vector.broadcast %205 : vector<2x1xf32> to vector<2x8xf32>
    %207 = arith.divf %203, %206 : vector<2x8xf32>
    %c0_76 = arith.constant 0 : index
    %c0_77 = arith.constant 0 : index
    %208 = vector.load %arg4[%c0_76, %c0_77] : memref<2x8xf32, #tpu.memory_space<vmem>>, vector<2x8xf32>
    tpu.vector_store %arg4[%c0_76, %c0_77], %207 {strides = array<i32>} : memref<2x8xf32, #tpu.memory_space<vmem>>, vector<2x8xf32>,
    return
  }
  func.func @transform_0(%arg0: i32) -> (i32, i32) {
    %c0_i32 = arith.constant 0 : i32
    %c0_i32_0 = arith.constant 0 : i32
    %c0_i32_1 = arith.constant 0 : i32
    return %c0_i32, %c0_i32_0 : i32, i32
  }
  func.func @transform_1(%arg0: i32) -> (i32, i32) {
    %c0_i32 = arith.constant 0 : i32
    %c0_i32_0 = arith.constant 0 : i32
    %c0_i32_1 = arith.constant 0 : i32
    return %c0_i32, %c0_i32_0 : i32, i32
  }
  func.func @transform_2(%arg0: i32) -> (i32, i32) {
    %c0_i32 = arith.constant 0 : i32
    %c0_i32_0 = arith.constant 0 : i32
    %c0_i32_1 = arith.constant 0 : i32
    return %c0_i32, %c0_i32_0 : i32, i32
  }
  func.func @transform_3(%arg0: i32) -> (i32, i32) {
    %c0_i32 = arith.constant 0 : i32
    %c0_i32_0 = arith.constant 0 : i32
    %c0_i32_1 = arith.constant 0 : i32
    return %c0_i32, %c0_i32_0 : i32, i32
  }
}

</mosaic_0001>

<bundles_post_ra>
// kernel: forward.1
= control target key start
LH: loop header
LB: loop body
LE: loop exit
PB: predicated region body
PF: predicated region fallthrough
CT: control target
= control target key end

     0   :  { %8 = vsyncpa [#allocation3], 0  ;;  %s2689_s0 = inlined_call_operand.vmem [shape: s32[16,1], index: 0, kind: input, shape index: {}]   ;;  %s2690_s1 = inlined_call_operand.vmem [shape: f32[16,16], index: 1, kind: input, shape index: {}]   ;;  %s2691_s2 = inlined_call_operand.hbm [shape: f32[424,128], index: 2, kind: input, shape index: {}]   ;;  %s2692_s3 = inlined_call_operand.hbm [shape: f32[2,8], index: 3, kind: output, shape index: {}]  }
   0x1   :  { %9 = vsyncpa [#allocation4], 0  ;;  %s2452_s12 = smov [#allocation2]  }
   0x2   :  { %s19_s13 = sshll.u32 %s2452_s12, 4  ;;  %s20_s13 = int_to_ptr.vmem [resolvable:$true] %s19_s13 }
   0x3   :  { %s2416_s14 = scalar_lea.vmem %s20_s13, 6784  ;;  %p2421_p1 = scmp.lt.s32.totalorder %s20_s13, %s20_s13 }
   0x4   :  { %p2417_p0 = scmp.ne.s32.totalorder %s20_s13, %s2416_s14  ;;  %p2422_p2 = scmp.lt.s32.totalorder %s2416_s14, %s2416_s14 }
   0x6   :  { %p2423_p3 = por %p2422_p2, %p2421_p1 }
   0x8   :  { %p2424_p4 = pnand %p2423_p3, %p2417_p0 }
   0xa   :  { %2427 = shalt.err (!%p2424_p4)
}
   0xb   :  { %s2453_s15 = smov 128   ;;  %s2454_s16 = smov 8  }
   0xc   :  { %25 = dma.hbm_to_vmem [thread:$0]  %s2691_s2, 6784, %s20_s13, [#allocation3], %s2453_s15, %s2453_s15, %s2454_s16  }
   0xd   :  { %2448 = dma.done.wait [#allocation3], 6784  }
   0xe   :  { %2449 = vsyncadd [#allocation3], 4294960512  ;;  %v2455_v0 = vmov 0   ;;  %v29_v1 = vld [vmem:[%s2689_s0] sm:$0xff]  ;;  %v50_v2 = vld [vmem:[#allocation2 + $0x38] sm:$0xff]  ;;  %v31_v14 = vlaneseq  ;;  %vm53_vm0 = vcmask 523264  }
   0xf   :  { %2359 = vset.pattern.permute.xlu0 %v2455_v0  ;;  %2173 = vmatprep.subr.mxu0 %v50_v2  ;;  %v49_v3 = vld [vmem:[#allocation2 + $0x30] sm:$0xff]  ;;  %v30_v4 = vld [vmem:[%s2689_s0 + $0x8] sm:$0xff]  ;;  %v47_v7 = vld [vmem:[#allocation2 + $0x20] sm:$0xff]  ;;  %v2456_v17 = vmov 0.0   ;;  %vm146_vm3 = vcmask 261120   ;;  %vm400_vm4 = vcmask 64512  }
  0x10   :  { %34 = vperm.xlu0 %2359, %v29_v1   ;;  %2174 = vmatpush3.msra.mxu0 %v50_v2  ;;  %v48_v5 = vld [vmem:[#allocation2 + $0x28] sm:$0xff]  ;;  %v139_v8 = vld [vmem:[#allocation2 + $0x60] sm:$0xff]  ;;  %v46_v9 = vld [vmem:[#allocation2 + $0x18] sm:$0xff]  ;;  %v2492_v15 = vand.u32 127, %v31_v14  ;;  %s2457_s0 = smov 120   ;;  %vm492_vm5 = vcmask 130048  }
  0x11   :  { %2175 = vmatprep.subr.mxu0 %v49_v3  ;;  %v140_v6 = vld [vmem:[#allocation2 + $0x68] sm:$0xff]  ;;  %v45_v10 = vld [vmem:[#allocation2 + $0x10] sm:$0xff]  ;;  %v43_v12 = vld [vmem:[#allocation2] sm:$0xff]  ;;  %s2459_s26 = smov 104   ;;  %vm2460_vm6 = vmmov 0   ;;  %vm1992_vm8 = vcmask 58368  }
  0x12   :  { %2176 = vmatpush3.msra.mxu0 %v49_v3  ;;  %2192 = vmatprep.subr.mxu1 %v140_v6  ;;  %v44_v11 = vld [vmem:[#allocation2 + $0x8] sm:$0xff]  ;;  %v314_v21 = vld [vmem:[#allocation2 + $0xa0] sm:$0xff]  ;;  %v138_v22 = vld [vmem:[#allocation2 + $0x58] sm:$0xff]  ;;  %s2461_s27 = smov [#allocation5]  }
  0x13   :  { %2177 = vmatprep.subr.mxu0 %v48_v5  ;;  %2193 = vmatpush3.msra.mxu1 %v140_v6  ;;  %v315_v13 = vld [vmem:[#allocation2 + $0xa8] sm:$0xff]  ;;  %v313_v23 = vld [vmem:[#allocation2 + $0x98] sm:$0xff]  ;;  %v137_v24 = vld [vmem:[#allocation2 + $0x50] sm:$0xff]  ;;  %s2011_s28 = sshll.u32 %s2461_s27, 4  ;;  %s2012_s28 = int_to_ptr.vmem [resolvable:$true] %s2011_s28 }
  0x14   :  { %37 = vperm.xlu0 %2359, %v30_v4   ;;  %2178 = vmatpush3.msra.mxu0 %v48_v5  ;;  %v312_v25 = vld [vmem:[#allocation2 + $0x90] sm:$0xff]  ;;  %v231_v26 = vld [vmem:[#allocation2 + $0x88] sm:$0xff]  ;;  %v51_v28 = vld [vmem:[#allocation2 + $0x40] sm:$0xff]  ;;  %s2428_s29 = scalar_lea.vmem %s2012_s28, 32  ;;  %p2433_p6 = scmp.lt.s32.totalorder %s2012_s28, %s2012_s28 }
  0x15   :  { %2179 = vmatprep.subr.mxu0 %v47_v7  ;;  %2194 = vmatprep.subr.mxu1 %v139_v8  ;;  %v52_v29 = vld [vmem:[#allocation2 + $0x48] sm:$0xff]  ;;  %v230_v33 = vld [vmem:[#allocation2 + $0x80] sm:$0xff]  ;;  %v229_v34 = vld [vmem:[#allocation2 + $0x78] sm:$0xff]  ;;  %p2429_p5 = scmp.ne.s32.totalorder %s2012_s28, %s2428_s29  ;;  %p2434_p7 = scmp.lt.s32.totalorder %s2428_s29, %s2428_s29 }
  0x16   :  { %2180 = vmatpush3.msra.mxu0 %v47_v7  ;;  %2195 = vmatpush3.msra.mxu1 %v139_v8  ;;  %v228_v35 = vld [vmem:[#allocation2 + $0x70] sm:$0xff]  ;;  %v2028_v36 = vld [vmem:[#allocation2 + $0x160] ss:$0 sm:$0xff]  ;;  %v2025_v45 = vld [vmem:[#allocation2 + $0x158] ss:$0 sm:$0xff] }
  0x17   :  { %2181 = vmatprep.subr.mxu0 %v46_v9  ;;  %2196 = vmatprep.subr.mxu1 %v138_v22  ;;  %v2022_v40 = vld [vmem:[#allocation2 + $0x150] ss:$0 sm:$0xff]  ;;  %v2561_v56 = vld [vmem:[%s2690_s1 + $0x8] sm:$0xff]  ;;  %v2566_v59 = vld [vmem:[%s2690_s1] sm:$0xff]  ;;  %s2458_s1 = smov 112   ;;  %p2435_p8 = por %p2434_p7, %p2433_p6 }
  0x18   :  { %2182 = vmatpush3.msra.mxu0 %v46_v9  ;;  %2197 = vmatpush3.msra.mxu1 %v138_v22 }
  0x19   :  { %2183 = vmatprep.subr.mxu0 %v45_v10  ;;  %2198 = vmatprep.subr.mxu1 %v137_v24  ;;  %p2436_p9 = pnand %p2435_p8, %p2429_p5 }
  0x1a   :  { %2184 = vmatpush3.msra.mxu0 %v45_v10  ;;  %2199 = vmatpush3.msra.mxu1 %v137_v24 }
  0x1b   :  { %2185 = vmatprep.subr.mxu0 %v44_v11  ;;  %2203 = vmatprep.subr.mxu1 %v231_v26 }
  0x1c   :  { %2186 = vmatpush3.msra.mxu0 %v44_v11 }
  0x1d   :  { %2187 = vmatprep.subr.mxu0 %v43_v12 }
  0x1e   :  { %2188 = vmatpush3.msra.mxu0 %v43_v12 }
  0x1f   :  { %2214 = vmatprep.subr.mxu0 %v315_v13 }
  0x8b   :  { %v35_v16 = vpop.permute.xlu0 %34 }
  0x8c   :  { %vm39_vm1 = vcmp.eq.s32.totalorder %v2492_v15, %v35_v16 }
  0x8d   :  { %v41_v18 = vsel %vm39_vm1, 1.0, %v2456_v17 }
  0x8e   :  { %2189 = vmatprep.mubr.msk.f32.mxu0 %vm53_vm0, %v41_v18 }
  0x8f   :  { %v38_v19 = vpop.permute.xlu0 %37 }
  0x90   :  { %vm40_vm2 = vcmp.eq.s32.totalorder %v2492_v15, %v38_v19 }
  0x91   :  { %v42_v20 = vsel %vm40_vm2, 1.0, %v2456_v17 }
  0x92   :  { %2190 = vmatmul.mubr.msk.f32.vlgmr.msra.gmra.mxu0 %vm53_vm0, %v42_v20 }
  0x93   :  { %2215 = vmatpush3.msra.mxu0 %v315_v13 }
  0x94   :  { %2216 = vmatprep.subr.mxu0 %v314_v21 }
  0x95   :  { %2217 = vmatpush3.msra.mxu0 %v314_v21 }
  0x96   :  { %2218 = vmatprep.subr.mxu0 %v313_v23 }
  0x97   :  { %2219 = vmatpush3.msra.mxu0 %v313_v23 }
  0x98   :  { %2220 = vmatprep.subr.mxu0 %v312_v25 }
  0x99   :  { %2221 = vmatpush3.msra.mxu0 %v312_v25 }
 0x152   :  { %v2191_v27 = vpop.f32.mrf.mxu0 }
 0x153   :  { %v2502_v32 = vadd.f32 %v2191_v27, %v52_v29 }
 0x154   :  { %v126_v30 = vpop.f32.mrf.mxu0 }
 0x155   :  { %v2500_v31 = vadd.f32 %v126_v30, %v51_v28 }
 0x157   :  { %2200 = vmatprep.mubr.msk.f32.mxu1 %vm146_vm3, %v2500_v31  ;;  %2222 = vmatprep.mubr.msk.f32.mxu0 %vm146_vm3, %v2500_v31 }
 0x158   :  { %2201 = vmatmul.mubr.msk.f32.vlgmr.msra.gmra.mxu1 %vm146_vm3, %v2502_v32  ;;  %2223 = vmatmul.mubr.msk.f32.vlgmr.msra.gmra.mxu0 %vm146_vm3, %v2502_v32 }
 0x159   :  { %2204 = vmatpush3.msra.mxu1 %v231_v26  ;;  %2211 = vmatprep.mubr.msk.f32.mxu1 %vm146_vm3, %v2500_v31 }
 0x15a   :  { %2205 = vmatprep.subr.mxu1 %v230_v33 }
 0x15b   :  { %2206 = vmatpush3.msra.mxu1 %v230_v33 }
 0x15c   :  { %2207 = vmatprep.subr.mxu1 %v229_v34 }
 0x15d   :  { %2208 = vmatpush3.msra.mxu1 %v229_v34 }
 0x15e   :  { %2209 = vmatprep.subr.mxu1 %v228_v35 }
 0x15f   :  { %2210 = vmatpush3.msra.mxu1 %v228_v35 }
 0x160   :  { %2212 = vmatmul.mubr.msk.f32.vlgmr.msra.gmra.mxu1 %vm146_vm3, %v2502_v32 }
 0x218   :  { %v2202_v37 = vpop.f32.mrf.mxu1  ;;  %v2224_v38 = vpop.f32.mrf.mxu0 }
 0x219   :  { %v2516_v39 = vadd.f32 %v2224_v38, %v2028_v36  ;;  %v2546_v50 = vadd.f32 %v2202_v37, %v2022_v40 }
 0x21a   :  { %v219_v41 = vpop.f32.mrf.mxu1  ;;  %v387_v42 = vpop.f32.mrf.mxu0 }
 0x21b   :  { %v2518_v43 = vadd.f32 %v2022_v40, %v219_v41  ;;  %v2520_v44 = vadd.f32 %v2028_v36, %v387_v42  ;;  %2232 = vmatprep.subr.mxu0 %v2516_v39  ;;  %v396_v41 = vld [vmem:[#allocation2 + $0xb0] sm:$0xff] }
 0x21c   :  { %2233 = vmatpush3.msra.mxu0 %v2516_v39 }
 0x21d   :  { %2234 = vmatprep.subr.mxu0 %v2520_v44  ;;  %596 = vrot.lane.b32.xlu0 %v2518_v43, %s2457_s0 }
 0x21e   :  { %2229 = vmatprep.mubr.msk.f32.mxu1 %vm400_vm4, %v2518_v43  ;;  %2235 = vmatpush3.msra.mxu0 %v2520_v44 }
 0x220   :  { %v2213_v46 = vpop.f32.mrf.mxu1 }
 0x221   :  { %v2530_v47 = vadd.f32 %v2213_v46, %v2025_v45 }
 0x222   :  { %v303_v48 = vpop.f32.mrf.mxu1 }
 0x223   :  { %v2532_v49 = vadd.f32 %v2025_v45, %v303_v48  ;;  %602 = vrot.lane.b32.xlu1 %v2530_v47, %s2457_s0  ;;  %2225 = vmatprep.subr.msk.mxu1 %vm400_vm4, %v2530_v47  ;;  %v397_v48 = vld [vmem:[#allocation2 + $0xb8] sm:$0xff] }
 0x224   :  { %2226 = vmatpush3.xpose.msk.msra.mxu1 %vm400_vm4, %v2530_v47 }
 0x225   :  { %2227 = vmatprep.subr.msk.mxu1 %vm400_vm4, %v2532_v49 }
 0x227   :  { %600 = vrot.lane.b32.xlu1 %v2532_v49, %s2457_s0 }
 0x228   :  { %2228 = vmatpush3.xpose.msk.msra.mxu1 %vm400_vm4, %v2532_v49 }
 0x22b   :  { %598 = vrot.lane.b32.xlu1 %v2546_v50, %s2457_s0  ;;  %2230 = vmatmul.mubr.msk.f32.vlgmr.msra.gmra.mxu1 %vm400_vm4, %v2546_v50 }
 0x28f   :  { %v597_v51 = vpop.permute.xlu0 %596 }
 0x290   :  { %2243 = vmatprep.mubr.msk.f32.mxu1 %vm400_vm4, %v597_v51 }
 0x295   :  { %v603_v52 = vpop.permute.xlu1 %602 }
 0x296   :  { %2239 = vmatprep.subr.msk.mxu1 %vm400_vm4, %v603_v52 }
 0x297   :  { %2240 = vmatpush3.xpose.msk.msra.mxu1 %vm400_vm4, %v603_v52 }
 0x299   :  { %v601_v53 = vpop.permute.xlu1 %600 }
 0x29a   :  { %2241 = vmatprep.subr.msk.mxu1 %vm400_vm4, %v601_v53 }
 0x29b   :  { %2242 = vmatpush3.xpose.msk.msra.mxu1 %vm400_vm4, %v601_v53 }
 0x29c   :  { %2258 = vmatprep.subr.mxu1 %v396_v41 }
 0x29d   :  { %v599_v54 = vpop.permute.xlu1 %598 }
 0x29e   :  { %2244 = vmatmul.mubr.msk.f32.vlgmr.msra.gmra.mxu1 %vm400_vm4, %v599_v54 }
 0x29f   :  { %2259 = vmatpush3.msra.mxu1 %v396_v41 }
 0x2eb   :  { %v2231_v55 = vpop.f32.mrf.mxu1 }
 0x2ec   :  { %v489_v57 = vmul.f32 0.35355338, %v2231_v55 }
 0x2ed   :  { %v479_v58 = vpop.f32.mrf.mxu1 }
 0x2ee   :  { %v488_v60 = vmul.f32 0.35355338, %v479_v58  ;;  %v491_v61 = vadd.f32 %v489_v57, %v2561_v56 }
 0x2f0   :  { %v496_v62 = vsel %vm492_vm5, %v491_v61, -inf  ;;  %v490_v63 = vadd.f32 %v488_v60, %v2566_v59 }
 0x2f1   :  { %497 = vmax.xlane.f32.xlu1 %v496_v62 }
 0x2f2   :  { %v493_v0 = vsel %vm492_vm5, %v490_v63, -inf }
 0x2f3   :  { %494 = vmax.xlane.f32.xlu0 %v493_v0 }
 0x35e   :  { %v2245_v1 = vpop.f32.mrf.mxu1 }
 0x35f   :  { %v688_v3 = vmul.f32 0.35355338, %v2245_v1 }
 0x360   :  { %v678_v2 = vpop.f32.mrf.mxu1 }
 0x361   :  { %v687_v4 = vmul.f32 0.35355338, %v678_v2  ;;  %v690_v7 = vadd.f32 %v688_v3, %v2561_v56 }
 0x363   :  { %v689_v5 = vadd.f32 %v687_v4, %v2566_v59  ;;  %v694_v8 = vsel %vm492_vm5, %v690_v7, -inf }
 0x365   :  { %v691_v6 = vsel %vm492_vm5, %v689_v5, -inf }
 0x366   :  { %692 = vmax.xlane.f32.xlu0 %v691_v6 }
 0x36a   :  { %695 = vmax.xlane.f32.xlu0 %v694_v8 }
 0x37a   :  { %v498_v9 = vpop.xlane.xlu1 %497 }
 0x37b   :  { %v500_v10 = vsub.f32 %v491_v61, %v498_v9 }
 0x37c   :  { %v495_v11 = vpop.xlane.xlu0 %494 }
 0x37d   :  { %v503_v12 = vmul.f32 1.442695, %v500_v10  ;;  %v499_v13 = vsub.f32 %v490_v63, %v495_v11 }
 0x37f   :  { %2360 = vpow2.f32 %v503_v12  ;;  %v501_v16 = vmul.f32 1.442695, %v499_v13 }
 0x381   :  { %2362 = vpow2.f32 %v501_v16 }
 0x38c   :  { %v2361_v18 = vpop.eup %2360 }
 0x38d   :  { %v508_v19 = vsel %vm492_vm5, %v2361_v18, 0.0 }
 0x38e   :  { %v2363_v20 = vpop.eup %2362  ;;  %509 = vadd.xlane.f32.xlu0 %v508_v19 }
 0x38f   :  { %v505_v21 = vsel %vm492_vm5, %v2363_v20, 0.0 }
 0x390   :  { %506 = vadd.xlane.f32.xlu1 %v505_v21 }
 0x3ef   :  { %v693_v22 = vpop.xlane.xlu0 %692 }
 0x3f0   :  { %v697_v23 = vsub.f32 %v689_v5, %v693_v22 }
 0x3f2   :  { %v699_v24 = vmul.f32 1.442695, %v697_v23 }
 0x3f3   :  { %v696_v25 = vpop.xlane.xlu0 %695 }
 0x3f4   :  { %2364 = vpow2.f32 %v699_v24  ;;  %v698_v26 = vsub.f32 %v690_v7, %v696_v25 }
 0x3f6   :  { %v701_v27 = vmul.f32 1.442695, %v698_v26 }
 0x3f8   :  { %2366 = vpow2.f32 %v701_v27 }
 0x401   :  { %v2365_v28 = vpop.eup %2364 }
 0x402   :  { %v703_v29 = vsel %vm492_vm5, %v2365_v28, 0.0 }
 0x403   :  { %704 = vadd.xlane.f32.xlu1 %v703_v29 }
 0x405   :  { %v2367_v30 = vpop.eup %2366 }
 0x406   :  { %v706_v33 = vsel %vm492_vm5, %v2367_v30, 0.0 }
 0x407   :  { %707 = vadd.xlane.f32.xlu0 %v706_v33 }
 0x414   :  { %717 = vrot.lane.b32.xlu1 %v2516_v39, %s2457_s0 }
 0x417   :  { %v510_v34 = vpop.xlane.xlu0 %509 }
 0x418   :  { %970 = vrot.lane.b32.xlu1 %v2530_v47, %s2458_s1  ;;  %2368 = vrcp.f32 %v510_v34 }
 0x419   :  { %v507_v35 = vpop.xlane.xlu1 %506 }
 0x41a   :  { %2370 = vrcp.f32 %v507_v35 }
 0x41c   :  { %968 = vrot.lane.b32.xlu1 %v2532_v49, %s2458_s1 }
 0x41d   :  { %715 = vrot.lane.b32.xlu0 %v2520_v44, %s2457_s0 }
 0x420   :  { %966 = vrot.lane.b32.xlu1 %v2546_v50, %s2458_s1 }
 0x421   :  { %964 = vrot.lane.b32.xlu0 %v2518_v43, %s2458_s1 }
 0x424   :  { %1255 = vrot.lane.b32.xlu1 %v2532_v49, %s2459_s26 }
 0x425   :  { %1257 = vrot.lane.b32.xlu0 %v2530_v47, %s2459_s26  ;;  %v2369_v36 = vpop.eup %2368 }
 0x426   :  { %v514_v40 = vmul.f32 %v2369_v36, %v2361_v18 }
 0x427   :  { %v2371_v37 = vpop.eup %2370 }
 0x428   :  { %1253 = vrot.lane.b32.xlu1 %v2546_v50, %s2459_s26  ;;  %v512_v38 = vmul.f32 %v2371_v37, %v2363_v20 }
 0x429   :  { %1251 = vrot.lane.b32.xlu0 %v2518_v43, %s2459_s26 }
 0x42a   :  { %2236 = vmatprep.mubr.msk.f32.mxu0 %vm492_vm5, %v512_v38 }
 0x42b   :  { %2237 = vmatmul.mubr.msk.f32.vlgmr.msra.gmra.mxu0 %vm492_vm5, %v514_v40 }
 0x48c   :  { %v705_v42 = vpop.xlane.xlu1 %704 }
 0x48d   :  { %2372 = vrcp.f32 %v705_v42 }
 0x490   :  { %v718_v45 = vpop.permute.xlu1 %717  ;;  %v708_v46 = vpop.xlane.xlu0 %707 }
 0x491   :  { %2374 = vrcp.f32 %v708_v46  ;;  %2246 = vmatprep.subr.mxu0 %v718_v45  ;;  %v398_v46 = vld [vmem:[#allocation2 + $0xc0] sm:$0xff] }
 0x492   :  { %2247 = vmatpush3.msra.mxu0 %v718_v45 }
 0x494   :  { %v716_v47 = vpop.permute.xlu0 %715  ;;  %v971_v52 = vpop.permute.xlu1 %970 }
 0x495   :  { %2248 = vmatprep.subr.mxu0 %v716_v47 }
 0x496   :  { %2249 = vmatpush3.msra.mxu0 %v716_v47 }
 0x497   :  { %2253 = vmatprep.subr.mxu0 %v397_v48 }
 0x498   :  { %v965_v55 = vpop.permute.xlu0 %964  ;;  %v969_v58 = vpop.permute.xlu1 %968 }
 0x49a   :  { %v2373_v43 = vpop.eup %2372 }
 0x49b   :  { %v710_v49 = vmul.f32 %v2373_v43, %v2365_v28 }
 0x49c   :  { %v1258_v61 = vpop.permute.xlu0 %1257  ;;  %v967_v62 = vpop.permute.xlu1 %966 }
 0x49d   :  { %2250 = vmatprep.mubr.msk.f32.mxu0 %vm492_vm5, %v710_v49 }
 0x49e   :  { %v2375_v50 = vpop.eup %2374 }
 0x49f   :  { %v712_v51 = vmul.f32 %v2375_v50, %v2367_v30 }
 0x4a0   :  { %v1252_v63 = vpop.permute.xlu0 %1251  ;;  %v1256_v0 = vpop.permute.xlu1 %1255 }
 0x4a1   :  { %2251 = vmatmul.mubr.msk.f32.vlgmr.msra.gmra.mxu0 %vm492_vm5, %v712_v51 }
 0x4a2   :  { %2254 = vmatpush3.msra.mxu0 %v397_v48 }
 0x4a3   :  { %2263 = vmatprep.subr.msk.mxu0 %vm400_vm4, %v971_v52 }
 0x4a4   :  { %v1254_v1 = vpop.permute.xlu1 %1253 }
 0x4eb   :  { %v2238_v53 = vpop.f32.mrf.mxu0 }
 0x4ed   :  { %v587_v54 = vpop.f32.mrf.mxu0 }
 0x4ee   :  { %2260 = vmatprep.mubr.msk.f32.mxu1 %vm400_vm4, %v587_v54 }
 0x4ef   :  { %2261 = vmatmul.mubr.msk.f32.vlgmr.msra.gmra.mxu1 %vm400_vm4, %v2238_v53 }
 0x561   :  { %v2252_v57 = vpop.f32.mrf.mxu0 }
 0x563   :  { %v793_v60 = vpop.f32.mrf.mxu0 }
 0x564   :  { %2255 = vmatprep.mubr.msk.f32.mxu0 %vm400_vm4, %v793_v60 }
 0x565   :  { %2256 = vmatmul.mubr.msk.f32.vlgmr.msra.gmra.mxu0 %vm400_vm4, %v2252_v57 }
 0x566   :  { %2264 = vmatpush3.xpose.msk.msra.mxu0 %vm400_vm4, %v971_v52  ;;  %2267 = vmatprep.mubr.msk.f32.mxu0 %vm400_vm4, %v965_v55 }
 0x567   :  { %2265 = vmatprep.subr.msk.mxu0 %vm400_vm4, %v969_v58 }
 0x56a   :  { %2266 = vmatpush3.xpose.msk.msra.mxu0 %vm400_vm4, %v969_v58 }
 0x56b   :  { %2282 = vmatprep.subr.msk.mxu0 %vm400_vm4, %v1258_v61 }
 0x56d   :  { %2268 = vmatmul.mubr.msk.f32.vlgmr.msra.gmra.mxu0 %vm400_vm4, %v967_v62 }
 0x56e   :  { %2283 = vmatpush3.xpose.msk.msra.mxu0 %vm400_vm4, %v1258_v61  ;;  %2286 = vmatprep.mubr.msk.f32.mxu0 %vm400_vm4, %v1252_v63 }
 0x56f   :  { %2284 = vmatprep.subr.msk.mxu0 %vm400_vm4, %v1256_v0 }
 0x572   :  { %2285 = vmatpush3.xpose.msk.msra.mxu0 %vm400_vm4, %v1256_v0 }
 0x575   :  { %2287 = vmatmul.mubr.msk.f32.vlgmr.msra.gmra.mxu0 %vm400_vm4, %v1254_v1 }
 0x5af   :  { %v2262_v55 = vpop.f32.mrf.mxu1 }
 0x5b1   :  { %v955_v57 = vpop.f32.mrf.mxu1 }
 0x625   :  { %v2620_v2 = vpop.f32.mrf.mxu0 }
 0x627   :  { %v2622_v3 = vpop.f32.mrf.mxu0 }
 0x62d   :  { %v2269_v4 = vpop.f32.mrf.mxu0 }
 0x62e   :  { %v1056_v5 = vmul.f32 0.35355338, %v2269_v4  ;;  %v399_v4 = vld [vmem:[#allocation2 + $0xc8] sm:$0xff] }
 0x62f   :  { %v1046_v6 = vpop.f32.mrf.mxu0 }
 0x630   :  { %v1055_v7 = vmul.f32 0.35355338, %v1046_v6  ;;  %v1058_v8 = vadd.f32 %v1056_v5, %v2561_v56  ;;  %v961_v5 = vadd.f32 %v2262_v55, %v2620_v2  ;;  %v1702_v55 = vld [vmem:[#allocation2 + $0x120] sm:$0xff] }
 0x632   :  { %v1062_v9 = vsel %vm492_vm5, %v1058_v8, -inf  ;;  %v1057_v10 = vadd.f32 %v1055_v7, %v2566_v59  ;;  %v956_v7 = vadd.f32 %v955_v57, %v2622_v3  ;;  %v1701_v57 = vld [vmem:[#allocation2 + $0x118] sm:$0xff] }
 0x633   :  { %1063 = vmax.xlane.f32.xlu1 %v1062_v9 }
 0x634   :  { %v1059_v11 = vsel %vm492_vm5, %v1057_v10, -inf }
 0x635   :  { %1060 = vmax.xlane.f32.xlu0 %v1059_v11  ;;  %v2288_v12 = vpop.f32.mrf.mxu0 }
 0x636   :  { %v1343_v35 = vmul.f32 0.35355338, %v2288_v12 }
 0x637   :  { %v1333_v13 = vpop.f32.mrf.mxu0 }
 0x638   :  { %v1342_v16 = vmul.f32 0.35355338, %v1333_v13  ;;  %v1345_v38 = vadd.f32 %v1343_v35, %v2561_v56  ;;  %v1591_v35 = vld [vmem:[#allocation2 + $0xe8] sm:$0xff] }
 0x639   :  { %2301 = vmatprep.subr.mxu0 %v1591_v35 }
 0x63a   :  { %v1344_v18 = vadd.f32 %v1342_v16, %v2566_v59  ;;  %v1349_v40 = vsel %vm492_vm5, %v1345_v38, -inf  ;;  %v2063_v16 = vld [vmem:[#allocation2 + $0x168] ss:$0 sm:$0xff]  ;;  %2302 = vmatpush3.msra.mxu0 %v1591_v35 }
 0x63c   :  { %v1346_v19 = vsel %vm492_vm5, %v1344_v18, -inf }
 0x644   :  { %1083 = vrot.lane.b32.xlu1 %v2516_v39, %s2458_s1 }
 0x668   :  { %1347 = vmax.xlane.f32.xlu1 %v1346_v19 }
 0x6bc   :  { %v1064_v20 = vpop.xlane.xlu1 %1063 }
 0x6bd   :  { %v1066_v21 = vsub.f32 %v1058_v8, %v1064_v20 }
 0x6be   :  { %v1061_v22 = vpop.xlane.xlu0 %1060 }
 0x6bf   :  { %v1069_v23 = vmul.f32 1.442695, %v1066_v21  ;;  %v1065_v24 = vsub.f32 %v1057_v10, %v1061_v22 }
 0x6c0   :  { %v1084_v25 = vpop.permute.xlu1 %1083 }
 0x6c1   :  { %2376 = vpow2.f32 %v1069_v23  ;;  %v1067_v26 = vmul.f32 1.442695, %v1065_v24  ;;  %2270 = vmatprep.subr.mxu1 %v1084_v25 }
 0x6c2   :  { %2271 = vmatpush3.msra.mxu1 %v1084_v25 }
 0x6c3   :  { %2378 = vpow2.f32 %v1067_v26 }
 0x6ce   :  { %v2377_v27 = vpop.eup %2376 }
 0x6cf   :  { %v1074_v28 = vsel %vm492_vm5, %v2377_v27, 0.0 }
 0x6d0   :  { %v2379_v29 = vpop.eup %2378  ;;  %1075 = vadd.xlane.f32.xlu0 %v1074_v28 }
 0x6d1   :  { %v1071_v59 = vsel %vm492_vm5, %v2379_v29, 0.0 }
 0x6d4   :  { %1072 = vadd.xlane.f32.xlu0 %v1071_v59 }
 0x6ea   :  { %1081 = vrot.lane.b32.xlu0 %v2520_v44, %s2458_s1 }
 0x6f1   :  { %v1348_v30 = vpop.xlane.xlu1 %1347 }
 0x6f2   :  { %v1352_v33 = vsub.f32 %v1344_v18, %v1348_v30 }
 0x6f4   :  { %v1354_v34 = vmul.f32 1.442695, %v1352_v33 }
 0x6f6   :  { %2380 = vpow2.f32 %v1354_v34 }
 0x703   :  { %v2381_v36 = vpop.eup %2380 }
 0x704   :  { %v1358_v37 = vsel %vm492_vm5, %v2381_v36, 0.0 }
 0x705   :  { %1359 = vadd.xlane.f32.xlu1 %v1358_v37  ;;  %v1588_v37 = vld [vmem:[#allocation2 + $0xd0] sm:$0xff] }
 0x709   :  { %1350 = vmax.xlane.f32.xlu0 %v1349_v40 }
 0x716   :  { %1370 = vrot.lane.b32.xlu1 %v2516_v39, %s2459_s26 }
 0x759   :  { %v1076_v41 = vpop.xlane.xlu0 %1075 }
 0x75a   :  { %2382 = vrcp.f32 %v1076_v41 }
 0x75d   :  { %v1073_v42 = vpop.xlane.xlu0 %1072 }
 0x75e   :  { %2384 = vrcp.f32 %v1073_v42 }
 0x761   :  { %v1082_v45 = vpop.permute.xlu0 %1081 }
 0x762   :  { %2272 = vmatprep.subr.mxu1 %v1082_v45 }
 0x763   :  { %2273 = vmatpush3.msra.mxu1 %v1082_v45 }
 0x764   :  { %2277 = vmatprep.subr.mxu1 %v398_v46 }
 0x767   :  { %v2383_v47 = vpop.eup %2382 }
 0x768   :  { %v1080_v56 = vmul.f32 %v2383_v47, %v2377_v27 }
 0x76b   :  { %v2385_v48 = vpop.eup %2384 }
 0x76c   :  { %v1078_v43 = vmul.f32 %v2385_v48, %v2379_v29  ;;  %v2064_v48 = vld [vmem:[#allocation2 + $0x170] ss:$0 sm:$0xff] }
 0x76e   :  { %2274 = vmatprep.mubr.msk.f32.mxu1 %vm492_vm5, %v1078_v43 }
 0x76f   :  { %2275 = vmatmul.mubr.msk.f32.vlgmr.msra.gmra.mxu1 %vm492_vm5, %v1080_v56 }
 0x770   :  { %2278 = vmatpush3.msra.mxu1 %v398_v46 }
 0x78e   :  { %v1360_v49 = vpop.xlane.xlu1 %1359 }
 0x792   :  { %v1371_v39 = vpop.permute.xlu1 %1370  ;;  %v1351_v50 = vpop.xlane.xlu0 %1350 }
 0x793   :  { %v1353_v51 = vsub.f32 %v1345_v38, %v1351_v50  ;;  %2289 = vmatprep.subr.mxu1 %v1371_v39  ;;  %v2065_v50 = vld [vmem:[#allocation2 + $0x178] ss:$0 sm:$0xff] }
 0x795   :  { %v1356_v52 = vmul.f32 1.442695, %v1353_v51 }
 0x797   :  { %2386 = vpow2.f32 %v1356_v52 }
 0x798   :  { %2388 = vrcp.f32 %v1360_v49 }
 0x7a4   :  { %v2387_v53 = vpop.eup %2386 }
 0x7a5   :  { %v1361_v54 = vsel %vm492_vm5, %v2387_v53, 0.0  ;;  %v2389_v58 = vpop.eup %2388 }
 0x7a6   :  { %1362 = vadd.xlane.f32.xlu0 %v1361_v54  ;;  %v1365_v63 = vmul.f32 %v2389_v58, %v2381_v36  ;;  %v1589_v36 = vld [vmem:[#allocation2 + $0xd8] sm:$0xff]  ;;  %v1703_v54 = vld [vmem:[#allocation2 + $0x128] sm:$0xff]  ;;  %v1700_v58 = vld [vmem:[#allocation2 + $0x110] sm:$0xff] }
 0x7bc   :  { %1368 = vrot.lane.b32.xlu0 %v2520_v44, %s2459_s26 }
 0x82f   :  { %v2276_v60 = vpop.f32.mrf.mxu1  ;;  %v1363_v61 = vpop.xlane.xlu0 %1362 }
 0x830   :  { %2390 = vrcp.f32 %v1363_v61  ;;  %v1698_v61 = vld [vmem:[#allocation2 + $0x100] sm:$0xff] }
 0x831   :  { %v1159_v62 = vpop.f32.mrf.mxu1 }
 0x832   :  { %2279 = vmatprep.mubr.msk.f32.mxu1 %vm400_vm4, %v1159_v62  ;;  %v1697_v62 = vld [vmem:[#allocation2 + $0xf8] sm:$0xff] }
 0x833   :  { %2280 = vmatmul.mubr.msk.f32.vlgmr.msra.gmra.mxu1 %vm400_vm4, %v2276_v60  ;;  %v1369_v0 = vpop.permute.xlu0 %1368  ;;  %v1699_v60 = vld [vmem:[#allocation2 + $0x108] sm:$0xff] }
 0x834   :  { %2290 = vmatpush3.msra.mxu1 %v1371_v39  ;;  %2293 = vmatprep.mubr.msk.f32.mxu1 %vm492_vm5, %v1365_v63  ;;  %v1696_v63 = vld [vmem:[#allocation2 + $0xf0] sm:$0xff] }
 0x835   :  { %2291 = vmatprep.subr.mxu1 %v1369_v0 }
 0x836   :  { %2292 = vmatpush3.msra.mxu1 %v1369_v0  ;;  %v2066_v0 = vld [vmem:[#allocation2 + $0x180] ss:$0 sm:$0xff] }
 0x837   :  { %2296 = vmatprep.subr.mxu1 %v399_v4 }
 0x83d   :  { %v2391_v44 = vpop.eup %2390 }
 0x83e   :  { %v1367_v1 = vmul.f32 %v2391_v44, %v2387_v53 }
 0x840   :  { %2294 = vmatmul.mubr.msk.f32.vlgmr.msra.gmra.mxu1 %vm492_vm5, %v1367_v1 }
 0x841   :  { %2297 = vmatpush3.msra.mxu1 %v399_v4 }
 0x842   :  { %2312 = vmatprep.subr.mxu1 %v1703_v54 }
 0x8f3   :  { %v2281_v6 = vpop.f32.mrf.mxu1 }
 0x8f4   :  { %v1250_v8 = vadd.f32 %v2281_v6, %v961_v5 }
 0x8f5   :  { %v1240_v9 = vpop.f32.mrf.mxu1 }
 0x8f6   :  { %v1249_v10 = vadd.f32 %v1240_v9, %v956_v7 }
 0x900   :  { %v2295_v11 = vpop.f32.mrf.mxu1 }
 0x902   :  { %v1446_v12 = vpop.f32.mrf.mxu1 }
 0x903   :  { %2298 = vmatprep.mubr.msk.f32.mxu1 %vm400_vm4, %v1446_v12 }
 0x904   :  { %2299 = vmatmul.mubr.msk.f32.vlgmr.msra.gmra.mxu1 %vm400_vm4, %v2295_v11 }
 0x905   :  { %2313 = vmatpush3.msra.mxu1 %v1703_v54 }
 0x906   :  { %2314 = vmatprep.subr.mxu1 %v1702_v55 }
 0x907   :  { %2315 = vmatpush3.msra.mxu1 %v1702_v55  ;;  %v2073_v55 = vld [vmem:[#allocation2 + $0x198] ss:$0 sm:$0xff] }
 0x908   :  { %2316 = vmatprep.subr.mxu1 %v1701_v57 }
 0x909   :  { %2317 = vmatpush3.msra.mxu1 %v1701_v57 }
 0x90a   :  { %2318 = vmatprep.subr.mxu1 %v1700_v58 }
 0x90b   :  { %2319 = vmatpush3.msra.mxu1 %v1700_v58 }
 0x90c   :  { %2320 = vmatprep.subr.mxu1 %v1699_v60 }
 0x90d   :  { %2321 = vmatpush3.msra.mxu1 %v1699_v60 }
 0x90e   :  { %2322 = vmatprep.subr.mxu1 %v1698_v61 }
 0x90f   :  { %2323 = vmatpush3.msra.mxu1 %v1698_v61 }
 0x910   :  { %2324 = vmatprep.subr.mxu1 %v1697_v62 }
 0x911   :  { %2325 = vmatpush3.msra.mxu1 %v1697_v62 }
 0x912   :  { %2326 = vmatprep.subr.mxu1 %v1696_v63 }
 0x913   :  { %2327 = vmatpush3.msra.mxu1 %v1696_v63 }
 0x9c4   :  { %v2300_v13 = vpop.f32.mrf.mxu1 }
 0x9c5   :  { %v1537_v18 = vadd.f32 %v2300_v13, %v1250_v8 }
 0x9c6   :  { %v1527_v19 = vpop.f32.mrf.mxu1 }
 0x9c7   :  { %v1544_v20 = vadd.f32 %v2063_v16, %v1537_v18  ;;  %v1536_v21 = vadd.f32 %v1527_v19, %v1249_v10 }
 0x9c9   :  { %v1543_v22 = vadd.f32 %v2063_v16, %v1536_v21  ;;  %v1546_v2 = vadd.f32 %v1544_v20, %v2502_v32 }
 0x9cb   :  { %v1552_v3 = vsel %vm146_vm3, %v1546_v2, 0.0  ;;  %v1545_v23 = vadd.f32 %v1543_v22, %v2500_v31  ;;  %v1590_v31 = vld [vmem:[#allocation2 + $0xe0] sm:$0xff] }
 0x9cc   :  { %1553 = vadd.xlane.f32.xlu0 %v1552_v3  ;;  %2303 = vmatprep.subr.mxu0 %v1590_v31 }
 0x9cd   :  { %v1549_v24 = vsel %vm146_vm3, %v1545_v23, 0.0  ;;  %2304 = vmatpush3.msra.mxu0 %v1590_v31 }
 0x9ce   :  { %1550 = vadd.xlane.f32.xlu1 %v1549_v24  ;;  %2305 = vmatprep.subr.mxu0 %v1589_v36 }
 0x9cf   :  { %2306 = vmatpush3.msra.mxu0 %v1589_v36 }
 0x9d0   :  { %2307 = vmatprep.subr.mxu0 %v1588_v37 }
 0x9d1   :  { %2308 = vmatpush3.msra.mxu0 %v1588_v37 }
 0x9d2   :  { %2331 = vmatprep.subr.mxu0 %v2456_v17 }
 0xa55   :  { %v1554_v25 = vpop.xlane.xlu0 %1553 }
 0xa56   :  { %v1557_v26 = vmul.f32 0.03125, %v1554_v25  ;;  %v2069_v25 = vld [vmem:[#allocation2 + $0x188] ss:$0 sm:$0xff] }
 0xa57   :  { %v1551_v27 = vpop.xlane.xlu1 %1550 }
 0xa58   :  { %v1559_v28 = vsub.f32 %v1546_v2, %v1557_v26  ;;  %v1556_v29 = vmul.f32 0.03125, %v1551_v27 }
 0xa5a   :  { %v1558_v59 = vsub.f32 %v1545_v23, %v1556_v29  ;;  %v1561_v30 = vmul.f32 %v1559_v28, %v1559_v28 }
 0xa5c   :  { %v1565_v33 = vsel %vm146_vm3, %v1561_v30, 0.0  ;;  %v1560_v34 = vmul.f32 %v1558_v59, %v1558_v59 }
 0xa5d   :  { %1566 = vadd.xlane.f32.xlu0 %v1565_v33 }
 0xa5e   :  { %v1562_v32 = vsel %vm146_vm3, %v1560_v34, 0.0 }
 0xa5f   :  { %1563 = vadd.xlane.f32.xlu1 %v1562_v32 }
 0xae6   :  { %v1567_v38 = vpop.xlane.xlu0 %1566 }
 0xae7   :  { %v1569_v40 = vmul.f32 0.03125, %v1567_v38 }
 0xae8   :  { %v1564_v41 = vpop.xlane.xlu1 %1563 }
 0xae9   :  { %v1571_v42 = vadd.f32 1e-05, %v1569_v40  ;;  %v1568_v45 = vmul.f32 0.03125, %v1564_v41 }
 0xaeb   :  { %2392 = vrsqrt.f32 %v1571_v42  ;;  %v1570_v46 = vadd.f32 1e-05, %v1568_v45 }
 0xaed   :  { %2394 = vrsqrt.f32 %v1570_v46 }
 0xaf8   :  { %v2393_v47 = vpop.eup %2392 }
 0xaf9   :  { %v1575_v43 = vmul.f32 %v2393_v47, %v1559_v28 }
 0xafa   :  { %v2395_v56 = vpop.eup %2394 }
 0xafb   :  { %v1574_v49 = vmul.f32 %v2395_v56, %v1558_v59  ;;  %v1581_v39 = vmul.f32 %v2064_v48, %v1575_v43 }
 0xafd   :  { %v1580_v51 = vmul.f32 %v2064_v48, %v1574_v49  ;;  %v1587_v53 = vadd.f32 %v2065_v50, %v1581_v39  ;;  %v1833_v39 = vshrl.u32 %v31_v14, 7  ;;  %v1912_v14 = vld [vmem:[#allocation2 + $0x140] sm:$0xff] }
 0xaff   :  { %v1586_v52 = vadd.f32 %v2065_v50, %v1580_v51  ;;  %v2072_v51 = vld [vmem:[#allocation2 + $0x190] ss:$0 sm:$0xff] }
 0xb01   :  { %2309 = vmatprep.mubr.msk.f32.mxu0 %vm146_vm3, %v1586_v52 }
 0xb02   :  { %2310 = vmatmul.mubr.msk.f32.vlgmr.msra.gmra.mxu0 %vm146_vm3, %v1587_v53 }
 0xb03   :  { %2335 = vmatprep.mubr.msk.f32.mxu0 %vm2460_vm6, %v2456_v17 }
 0xbc2   :  { %v2311_v44 = vpop.f32.mrf.mxu0 }
 0xbc3   :  { %v1675_v1 = vadd.f32 %v2311_v44, %v2066_v0  ;;  %v1910_v44 = vld [vmem:[#allocation2 + $0x130] sm:$0xff] }
 0xbc4   :  { %v1669_v4 = vpop.f32.mrf.mxu0 }
 0xbc5   :  { %v1679_v5 = vmul.f32 %v1675_v1, %v1675_v1  ;;  %v1670_v6 = vadd.f32 %v2066_v0, %v1669_v4  ;;  %v1913_v0 = vld [vmem:[#allocation2 + $0x148] sm:$0xff] }
 0xbc7   :  { %v1681_v7 = vmul.f32 %v1679_v5, %v1675_v1  ;;  %v1678_v8 = vmul.f32 %v1670_v6, %v1670_v6  ;;  %v2075_v5 = vld [vmem:[#allocation2 + $0x1a0] ss:$0 sm:$0xff] }
 0xbc9   :  { %v1683_v9 = vmul.f32 0.044715, %v1681_v7  ;;  %v1680_v10 = vmul.f32 %v1678_v8, %v1670_v6 }
 0xbcb   :  { %v1685_v11 = vadd.f32 %v1683_v9, %v1675_v1  ;;  %v1682_v12 = vmul.f32 0.044715, %v1680_v10 }
 0xbcd   :  { %v1687_v13 = vmul.f32 0.7978846, %v1685_v11  ;;  %v1684_v16 = vadd.f32 %v1682_v12, %v1670_v6 }
 0xbcf   :  { %2396 = vtanh.f32 %v1687_v13  ;;  %v1686_v18 = vmul.f32 0.7978846, %v1684_v16 }
 0xbd1   :  { %2398 = vtanh.f32 %v1686_v18 }
 0xbdc   :  { %v2397_v19 = vpop.eup %2396 }
 0xbdd   :  { %v1691_v20 = vadd.f32 1.0, %v2397_v19 }
 0xbde   :  { %v2399_v21 = vpop.eup %2398 }
 0xbdf   :  { %v1690_v22 = vadd.f32 1.0, %v2399_v21  ;;  %v1693_v2 = vmul.f32 0.5, %v1691_v20 }
 0xbe1   :  { %v1692_v3 = vmul.f32 0.5, %v1690_v22  ;;  %v1695_v24 = vmul.f32 %v1693_v2, %v1675_v1 }
 0xbe3   :  { %v1694_v23 = vmul.f32 %v1692_v3, %v1670_v6 }
 0xbe5   :  { %2328 = vmatprep.mubr.msk.f32.mxu1 %vm53_vm0, %v1694_v23 }
 0xbe6   :  { %2329 = vmatmul.mubr.msk.f32.vlgmr.msra.gmra.mxu1 %vm53_vm0, %v1695_v24 }
 0xca6   :  { %v2330_v26 = vpop.f32.mrf.mxu1 }
 0xca7   :  { %v1787_v27 = vadd.f32 %v2330_v26, %v2069_v25 }
 0xca8   :  { %v1781_v28 = vpop.f32.mrf.mxu1 }
 0xca9   :  { %v1782_v29 = vadd.f32 %v2069_v25, %v1781_v28  ;;  %v1791_v59 = vadd.f32 %v1787_v27, %v1587_v53 }
 0xcab   :  { %v1797_v30 = vsel %vm146_vm3, %v1791_v59, 0.0  ;;  %v1790_v33 = vadd.f32 %v1782_v29, %v1586_v52  ;;  %v1834_v52 = vmul.u32 8, %v1833_v39 }
 0xcac   :  { %1798 = vadd.xlane.f32.xlu1 %v1797_v30 }
 0xcad   :  { %v1794_v34 = vsel %vm146_vm3, %v1790_v33, 0.0  ;;  %vm1835_vm7 = vcmp.eq.s32.totalorder %v2492_v15, %v1834_v52  ;;  %v1911_v15 = vld [vmem:[#allocation2 + $0x138] sm:$0xff] }
 0xcae   :  { %1795 = vadd.xlane.f32.xlu0 %v1794_v34  ;;  %v1836_v63 = vsel %vm1835_vm7, 1.0, %v2456_v17 }
 0xd35   :  { %v1799_v32 = vpop.xlane.xlu1 %1798 }
 0xd36   :  { %v1801_v35 = vmul.f32 0.03125, %v1799_v32 }
 0xd37   :  { %v1796_v31 = vpop.xlane.xlu0 %1795 }
 0xd38   :  { %v1803_v36 = vsub.f32 %v1791_v59, %v1801_v35  ;;  %v1800_v37 = vmul.f32 0.03125, %v1796_v31 }
 0xd3a   :  { %v1802_v38 = vsub.f32 %v1790_v33, %v1800_v37  ;;  %v1805_v40 = vmul.f32 %v1803_v36, %v1803_v36 }
 0xd3c   :  { %v1809_v41 = vsel %vm146_vm3, %v1805_v40, 0.0  ;;  %v1804_v42 = vmul.f32 %v1802_v38, %v1802_v38 }
 0xd3d   :  { %1810 = vadd.xlane.f32.xlu1 %v1809_v41 }
 0xd3e   :  { %v1806_v45 = vsel %vm146_vm3, %v1804_v42, 0.0 }
 0xd3f   :  { %1807 = vadd.xlane.f32.xlu0 %v1806_v45 }
 0xdc6   :  { %v1811_v46 = vpop.xlane.xlu1 %1810 }
 0xdc7   :  { %v1813_v47 = vmul.f32 0.03125, %v1811_v46 }
 0xdc8   :  { %v1808_v48 = vpop.xlane.xlu0 %1807 }
 0xdc9   :  { %v1815_v43 = vadd.f32 1e-05, %v1813_v47  ;;  %v1812_v56 = vmul.f32 0.03125, %v1808_v48 }
 0xdcb   :  { %2400 = vrsqrt.f32 %v1815_v43  ;;  %v1814_v49 = vadd.f32 1e-05, %v1812_v56 }
 0xdcd   :  { %2402 = vrsqrt.f32 %v1814_v49 }
 0xdd8   :  { %v2401_v50 = vpop.eup %2400 }
 0xdd9   :  { %v1819_v53 = vmul.f32 %v2401_v50, %v1803_v36 }
 0xdda   :  { %v2403_v54 = vpop.eup %2402 }
 0xddb   :  { %v1825_v57 = vmul.f32 %v2072_v51, %v1819_v53  ;;  %v1818_v58 = vmul.f32 %v2403_v54, %v1802_v38 }
 0xddd   :  { %v1831_v60 = vadd.f32 %v2073_v55, %v1825_v57  ;;  %v1824_v61 = vmul.f32 %v2072_v51, %v1818_v58 }
 0xddf   :  { %2332 = vmatpush3.msra.mxu0 %v1831_v60  ;;  %v1830_v62 = vadd.f32 %v2073_v55, %v1824_v61 }
 0xde0   :  { %2333 = vmatprep.subr.mxu0 %v2456_v17 }
 0xde1   :  { %2334 = vmatpush3.msra.mxu0 %v1830_v62 }
 0xde2   :  { %2336 = vmatmul.mubr.msk.f32.vlgmr.msra.gmra.mxu0 %vm492_vm5, %v1836_v63  ;;  %2338 = vmatprep.subr.mxu0 %v2456_v17 }
 0xde3   :  { %2339 = vmatpush3.msra.mxu0 %v1913_v0  ;;  %2346 = vmatprep.mubr.msk.f32.mxu0 %vm2460_vm6, %v2456_v17 }
 0xde4   :  { %2340 = vmatprep.subr.mxu0 %v2456_v17 }
 0xde5   :  { %2341 = vmatpush3.msra.mxu0 %v1912_v14 }
 0xde6   :  { %2342 = vmatprep.subr.mxu0 %v2456_v17 }
 0xde7   :  { %2343 = vmatpush3.msra.mxu0 %v1911_v15 }
 0xde8   :  { %2344 = vmatprep.subr.mxu0 %v2456_v17 }
 0xde9   :  { %2345 = vmatpush3.msra.mxu0 %v1910_v44 }
 0xea2   :  { %v1906_v1 = vpop.f32.mrf.mxu0 }
 0xea3   :  { %2347 = vmatmul.mubr.msk.f32.vlgmr.msra.gmra.mxu0 %vm146_vm3, %v1906_v1 }
 0xea4   :  { %v2337_v4 = vpop.f32.mrf.mxu0 }
 0xf63   :  { %v1988_v6 = vpop.f32.mrf.mxu0 }
 0xf64   :  { %v1989_v7 = vadd.f32 %v2075_v5, %v1988_v6 }
 0xf65   :  { %v2348_v8 = vpop.f32.mrf.mxu0 }
 0xf66   :  { %v1993_v9 = vsel %vm1992_vm8, %v1989_v7, -inf }
 0xf67   :  { %1994 = vmax.xlane.f32.xlu1 %v1993_v9 }
 0xff0   :  { %v1995_v10 = vpop.xlane.xlu1 %1994 }
 0xff1   :  { %v1996_v11 = vsub.f32 %v1989_v7, %v1995_v10 }
 0xff3   :  { %v1997_v12 = vmul.f32 1.442695, %v1996_v11 }
 0xff5   :  { %2404 = vpow2.f32 %v1997_v12 }
0x1002   :  { %v2405_v13 = vpop.eup %2404 }
0x1003   :  { %v1999_v17 = vsel %vm1992_vm8, %v2405_v13, 0.0 }
0x1004   :  { %2000 = vadd.xlane.f32.xlu0 %v1999_v17 }
0x108d   :  { %v2001_v16 = vpop.xlane.xlu0 %2000 }
0x108e   :  { %2406 = vrcp.f32 %v2001_v16 }
0x109b   :  { %v2407_v18 = vpop.eup %2406 }
0x109c   :  { %v2003_v19 = vmul.f32 %v2407_v18, %v2405_v13 }
0x109e   :  { %2004 = vst.msk [vmem:[#allocation5] sm:$0x3] %vm1992_vm8, %v2003_v19 }
0x109f   :  { %2439 = shalt.err (!%p2436_p9)
}
0x10a0   :  { %2014 = dma.vmem_to_hbm [thread:$0]  %s2012_s28, 32, %s2692_s3, [#allocation4]  }
0x10a1   :  { %2450 = dma.done.wait [#allocation4], 32  }
0x10a2   :  { %2451 = vsyncadd [#allocation4], 4294967264 }
0x10a3   :  { %2018 = vsyncpa [#allocation3], 1 }
0x10a4   :  { %2019 = vsyncpa [#allocation4], 1 }

</bundles_post_ra>
